<compile_context>
chip_gen: v6e
topology: v6e:2x2x1
jax: 0.10.0
libtpu: 0.0.40
codegen_flags: <defaults>
</compile_context>

<pallas_src>
import jax
import jax.numpy as jnp
from jax import lax
from jax.experimental import pallas as pl
from jax.experimental.pallas import tpu as pltpu

LN_EPS = 1e-5


# --------------------------------------------------------------------------- #
# Kernel
# --------------------------------------------------------------------------- #
def _make_kernel(ksize, pred_len, matmul_dtype):
    def mm(a, b):
        # Weight matmuls: optionally run the MXU in bf16; accumulate in f32.
        if matmul_dtype is not None:
            a = a.astype(matmul_dtype)
            b = b.astype(matmul_dtype)
        return jnp.dot(a, b, preferred_element_type=jnp.float32)

    def group_ln(h, gavg, gamma_t, beta_t):
        # h: (rows, Bt*H) f32.  gavg is a block-diagonal (Bt*H, Bt*H) group-mean
        # operator, so LayerNorm statistics are per (batch, row) feature group.
        # Stats always stay in f32 (matches the reference numerics).
        mu = jnp.dot(h, gavg, preferred_element_type=jnp.float32)
        c = h - mu
        var = jnp.dot(c * c, gavg, preferred_element_type=jnp.float32)
        return c * lax.rsqrt(var + LN_EPS) * gamma_t + beta_t

    def kernel(x_ref, w1_ref, b1_ref, g1_ref, be1_ref, gavg1_ref,
               w2_ref, b2_ref, g2_ref, be2_ref, gavg2_ref,
               wstack_ref, w3bd_ref, bias_ref, out_ref):
        # ---- MLP (Linear + LayerNorm + ReLU) x2, batch folded into lanes ----
        x = x_ref[...]                                        # (L, Bt*T)
        h = mm(x, w1_ref[...]) + b1_ref[...]                  # (L, Bt*H1) f32
        h = jnp.maximum(group_ln(h, gavg1_ref[...], g1_ref[...], be1_ref[...]), 0.0)
        h = mm(h, w2_ref[...]) + b2_ref[...]                  # (L, Bt*H2) f32
        h = jnp.maximum(group_ln(h, gavg2_ref[...], g2_ref[...], be2_ref[...]), 0.0)

        # ---- Conv1d + Linear(H2->V) + time_proj, folded -----------------------
        # tall[k*P:(k+1)*P] = (wp @ cw[k]) @ h  for every batch of the block.
        tall = mm(wstack_ref[...], h)                         # (K*P, Bt*H2)
        w3bd = w3bd_ref[...]                                  # (K, Bt*H2, Bt*V)
        acc = bias_ref[...]                                   # (P, Bt*V) f32
        for k in range(ksize):                                # static; K is small
            acc = acc + mm(tall[k * pred_len:(k + 1) * pred_len, :], w3bd[k])

        # Single lane-dense store for the whole batch block.
        out_ref[...] = acc.astype(out_ref.dtype)

    return kernel


# --------------------------------------------------------------------------- #
# Wrapper
# --------------------------------------------------------------------------- #
def _largest_divisor_leq(n, cap):
    best = 1
    for d in range(1, min(n, cap) + 1):
        if n % d == 0:
            best = d
    return best


def timester_pallas(x, params, *, batch_block=None, matmul_dtype=None):
    (w1, b1, g1, be1, w2, b2, g2, be2, cw, cb, w3, b3, wp, bp) = params
    B, L, T = x.shape
    H1 = w1.shape[1]
    H2 = w2.shape[1]
    P = wp.shape[0]
    V = w3.shape[1]
    K = cw.shape[0]
    pad_l = (K - 1) // 2

    # --- batch-block choice: keep block-diag contraction within one MXU pass
    # (<=256 lanes of contraction) and give the grid several steps.
    max_feat = max(T, H1, H2, V)
    if batch_block is None:
        cap = max(1, 256 // max_feat)
        if B >= 16:
            cap = min(cap, B // 8)   # >= 8 grid steps: DMA/compute overlap
        elif B >= 2:
            cap = min(cap, B // 2)   # >= 2 grid steps: megacore sharding
        batch_block = _largest_divisor_leq(B, max(cap, 1))
    assert B % batch_block == 0, "batch must be divisible by batch_block"
    Bt = batch_block
    nb = B // Bt

    # --- host-side (XLA, tiny) parameter preprocessing -----------------------
    f32 = jnp.float32
    eyeb = jnp.eye(Bt, dtype=f32)

    def bd(w):            # block-diagonal replication over the batch block
        return jnp.kron(eyeb, w.astype(f32))

    def tile_cols(v):     # tile a (rows, feat) row-vector/bias over the block
        return jnp.tile(v.astype(f32), (1, Bt))

    # MLP parameters
    w1_bd, w2_bd = bd(w1), bd(w2)
    b1_t, g1_t, be1_t = tile_cols(b1), tile_cols(g1), tile_cols(be1)
    b2_t, g2_t, be2_t = tile_cols(b2), tile_cols(g2), tile_cols(be2)
    gavg1 = jnp.kron(eyeb, jnp.full((H1, H1), 1.0 / H1, f32))
    gavg2 = jnp.kron(eyeb, jnp.full((H2, H2), 1.0 / H2, f32))

    # Fold Conv1d('same') + Linear(H2->V) + time_proj:
    #   out[b] = sum_k (wp @ cw[k]) @ h[b] @ shift_rows(w3, k - pad_l) + BIAS
    wpk = jnp.einsum("pl,kli->kpi", wp, cw)            # (K, P, L) = wp @ cw[k]
    wstack = wpk.reshape(K * P, L)

    def shift_rows(w, s):
        if s == 0:
            return w
        z = jnp.zeros((abs(s), w.shape[1]), w.dtype)
        if s > 0:
            return jnp.concatenate([z, w[: w.shape[0] - s]], axis=0)
        return jnp.concatenate([w[-s:], z], axis=0)

    w3bd = jnp.stack([bd(shift_rows(w3, k - pad_l)) for k in range(K)])  # (K,BtH2,BtV)
    bias = ((wp @ cb) @ jnp.sum(w3, axis=0, keepdims=True)
            + jnp.sum(wp, axis=1, keepdims=True) @ b3
            + bp)                                           # (P, V); bp broadcasts
    bias_t = tile_cols(bias)                                # (P, Bt*V)

    if matmul_dtype is not None:
        # Ship the large weight operands narrow (halves their DMA/VMEM bytes).
        w1_bd = w1_bd.astype(matmul_dtype)
        w2_bd = w2_bd.astype(matmul_dtype)
        wstack = wstack.astype(matmul_dtype)
        w3bd = w3bd.astype(matmul_dtype)

    # Input re-laid out as (nb, L, Bt*T): lane-dense blocks along the batch axis.
    x3 = jnp.transpose(x, (1, 0, 2)).reshape(L, nb, Bt * T).transpose(1, 0, 2)

    flat_params = (w1_bd, b1_t, g1_t, be1_t, gavg1,
                   w2_bd, b2_t, g2_t, be2_t, gavg2,
                   wstack, w3bd, bias_t)
    kernel = _make_kernel(K, P, matmul_dtype)

    # VMEM budget derived from actual block / parameter sizes (not hard-coded).
    itemsize = x.dtype.itemsize
    param_bytes = sum(int(p.size) * p.dtype.itemsize for p in flat_params)
    blk_bytes = (L * Bt * T + P * Bt * V) * itemsize
    interm_bytes = (L * Bt * max(H1, H2) + K * P * Bt * H2 + P * Bt * V) * 4
    vmem_limit = int(min(max(32 << 20,
                             2 * (2 * blk_bytes + 2 * param_bytes + 2 * interm_bytes)),
                         112 << 20))

    def run(single_buffer_params):
        def param_spec(a):
            nd = a.ndim
            idx = lambda i, _nd=nd: (0,) * _nd
            if single_buffer_params:
                # Grid-invariant params: no need to double-buffer them.
                return pl.BlockSpec(a.shape, idx, pipeline_mode=pl.Buffered(1))
            return pl.BlockSpec(a.shape, idx)

        in_specs = [pl.BlockSpec((None, L, Bt * T), lambda i: (i, 0, 0))]
        in_specs += [param_spec(p) for p in flat_params]
        out_specs = pl.BlockSpec((None, P, Bt * V), lambda i: (i, 0, 0))

        return pl.pallas_call(
            kernel,
            out_shape=jax.ShapeDtypeStruct((nb, P, Bt * V), x.dtype),
            grid_spec=pltpu.PrefetchScalarGridSpec(
                num_scalar_prefetch=0,
                grid=(nb,),
                in_specs=in_specs,
                out_specs=out_specs,
            ),
            compiler_params=pltpu.CompilerParams(
                dimension_semantics=("parallel",),
                vmem_limit_bytes=vmem_limit,
            ),
        )(x3, *flat_params)

    try:
        out3 = run(True)          # single-buffered grid-invariant parameters
    except Exception:             # fallback if Buffered(1) is not supported
        out3 = run(False)

    # (nb, P, Bt*V) -> (B, P, V)
    return out3.reshape(nb, P, Bt, V).transpose(0, 2, 1, 3).reshape(B, P, V)


# --------------------------------------------------------------------------- #
# Parameters + pure-JAX reference (mirrors the PyTorch forward)
# --------------------------------------------------------------------------- #
def init_params(key, time_dim, n_variate, n_out, seq_len, pred_len, rda, rdb, ksize):
    h1 = n_variate // rda
    h2 = n_variate // rdb
    ks = jax.random.split(key, 14)

    def u(k, shape, scale=0.2):
        return (jax.random.uniform(k, shape, jnp.float32) - 0.5) * 2.0 * scale

    w1 = u(ks[0], (time_dim, h1))            # Linear weights stored as (in, out)
    b1 = u(ks[1], (1, h1))
    g1 = 1.0 + u(ks[2], (1, h1), 0.1)        # LayerNorm gamma
    be1 = u(ks[3], (1, h1), 0.1)             # LayerNorm beta
    w2 = u(ks[4], (h1, h2))
    b2 = u(ks[5], (1, h2))
    g2 = 1.0 + u(ks[6], (1, h2), 0.1)
    be2 = u(ks[7], (1, h2), 0.1)
    cw = u(ks[8], (ksize, seq_len, seq_len))  # cw[k, out_ch, in_ch]
    cb = u(ks[9], (seq_len, 1))
    w3 = u(ks[10], (h2, n_out))
    b3 = u(ks[11], (1, n_out))
    wp = u(ks[12], (pred_len, seq_len))       # time_proj weight (PyTorch (out,in))
    bp = u(ks[13], (pred_len, 1))
    return (w1, b1, g1, be1, w2, b2, g2, be2, cw, cb, w3, b3, wp, bp)


def timester_reference(x, params):
    """Pure-JAX reference mirroring the PyTorch forward semantics."""
    (w1, b1, g1, be1, w2, b2, g2, be2, cw, cb, w3, b3, wp, bp) = params

    def ln(h, g, be):
        mu = jnp.mean(h, axis=-1, keepdims=True)
        var = jnp.mean(jnp.square(h - mu), axis=-1, keepdims=True)
        return (h - mu) / jnp.sqrt(var + LN_EPS) * g + be

    h = x @ w1 + b1
    h = jnp.maximum(ln(h, g1, be1), 0.0)
    h = h @ w2 + b2
    h = jnp.maximum(ln(h, g2, be2), 0.0)            # (B, L, H2)

    K = cw.shape[0]
    pad_l = (K - 1) // 2
    pad_r = K - 1 - pad_l
    H2 = h.shape[-1]
    hp = jnp.pad(h, ((0, 0), (0, 0), (pad_l, pad_r)))
    conv = jnp.zeros_like(h)
    for k in range(K):
        conv = conv + jnp.einsum("oi,bij->boj", cw[k], hp[:, :, k:k + H2])
    conv = conv + cb[None, :, :]

    h = conv @ w3 + b3                               # (B, L, n_out)
    out = jnp.einsum("pl,blv->bpv", wp, h) + bp[None, :, :]   # (B, P, n_out)
    return out


# --------------------------------------------------------------------------- #
# Demo / correctness check
# --------------------------------------------------------------------------- #
if __name__ == "__main__":
    B, time_dim, n_variate, n_out = 4, 4, 8, 8
    seq_len, pred_len, rda, rdb, ksize = 16, 16, 4, 1, 5

    key = jax.random.PRNGKey(0)
    kx, kp = jax.random.split(key)
    x = jax.random.normal(kx, (B, seq_len, time_dim), dtype=jnp.float32)
    params = init_params(kp, time_dim, n_variate, n_out,
                         seq_len, pred_len, rda, rdb, ksize)

    # f32 path (default) against the reference.
    out = jax.block_until_ready(timester_pallas(x, params))
    ref = timester_reference(x, params)
    assert out.shape == (B, pred_len, n_out)
    assert jnp.allclose(out, ref, atol=1e-4, rtol=1e-4), "mismatch vs reference"

    # bf16 MXU-operand path (recommended default on v6e/v7x).  Sanity only:
    # with such tiny LayerNorm widths the bf16 error bound is not tight enough
    # for an allclose check against the f32 reference.
    out_bf16 = jax.block_until_ready(
        timester_pallas(x, params, matmul_dtype=jnp.bfloat16))
    assert out_bf16.shape == (B, pred_len, n_out)
    assert bool(jnp.all(jnp.isfinite(out_bf16)))

    print("KERNEL_OK")
</pallas_src>

<mosaic_0001>
module attributes {stable_mosaic.version = 11 : i64} {
  func.func @kernel(%arg0: i32, %arg1: memref<1x16x8xf32, #tpu.memory_space<vmem>>, %arg2: memref<8x4xf32, #tpu.memory_space<vmem>>, %arg3: memref<1x4xf32, #tpu.memory_space<vmem>>, %arg4: memref<1x4xf32, #tpu.memory_space<vmem>>, %arg5: memref<1x4xf32, #tpu.memory_space<vmem>>, %arg6: memref<4x4xf32, #tpu.memory_space<vmem>>, %arg7: memref<4x16xf32, #tpu.memory_space<vmem>>, %arg8: memref<1x16xf32, #tpu.memory_space<vmem>>, %arg9: memref<1x16xf32, #tpu.memory_space<vmem>>, %arg10: memref<1x16xf32, #tpu.memory_space<vmem>>, %arg11: memref<16x16xf32, #tpu.memory_space<vmem>>, %arg12: memref<80x16xf32, #tpu.memory_space<vmem>>, %arg13: memref<5x16x16xf32, #tpu.memory_space<vmem>>, %arg14: memref<16x16xf32, #tpu.memory_space<vmem>>, %arg15: memref<1x16x16xf32, #tpu.memory_space<vmem>>) attributes {dimension_semantics = [#tpu.dimension_semantics<parallel>], iteration_bounds = array<i64: 2>, scalar_prefetch = 0 : i64, scratch_operands = 0 : i64, tpu.core_type = #tpu.core_type<tc>, window_params = [{transform_indices = @transform_0, window_bounds = array<i64: 1, 16, 8>}, {pipeline_mode = #tpu.pipeline_mode<synchronous>, transform_indices = @transform_1, window_bounds = array<i64: 8, 4>}, {pipeline_mode = #tpu.pipeline_mode<synchronous>, transform_indices = @transform_2, window_bounds = array<i64: 1, 4>}, {pipeline_mode = #tpu.pipeline_mode<synchronous>, transform_indices = @transform_3, window_bounds = array<i64: 1, 4>}, {pipeline_mode = #tpu.pipeline_mode<synchronous>, transform_indices = @transform_4, window_bounds = array<i64: 1, 4>}, {pipeline_mode = #tpu.pipeline_mode<synchronous>, transform_indices = @transform_5, window_bounds = array<i64: 4, 4>}, {pipeline_mode = #tpu.pipeline_mode<synchronous>, transform_indices = @transform_6, window_bounds = array<i64: 4, 16>}, {pipeline_mode = #tpu.pipeline_mode<synchronous>, transform_indices = @transform_7, window_bounds = array<i64: 1, 16>}, {pipeline_mode = #tpu.pipeline_mode<synchronous>, transform_indices = @transform_8, window_bounds = array<i64: 1, 16>}, {pipeline_mode = #tpu.pipeline_mode<synchronous>, transform_indices = @transform_9, window_bounds = array<i64: 1, 16>}, {pipeline_mode = #tpu.pipeline_mode<synchronous>, transform_indices = @transform_10, window_bounds = array<i64: 16, 16>}, {pipeline_mode = #tpu.pipeline_mode<synchronous>, transform_indices = @transform_11, window_bounds = array<i64: 80, 16>}, {pipeline_mode = #tpu.pipeline_mode<synchronous>, transform_indices = @transform_12, window_bounds = array<i64: 5, 16, 16>}, {pipeline_mode = #tpu.pipeline_mode<synchronous>, transform_indices = @transform_13, window_bounds = array<i64: 16, 16>}, {transform_indices = @transform_14, window_bounds = array<i64: 1, 16, 16>}]} {
    %c0 = arith.constant 0 : index
    %c0_0 = arith.constant 0 : index
    %c0_1 = arith.constant 0 : index
    %0 = vector.load %arg1[%c0, %c0_0, %c0_1] : memref<1x16x8xf32, #tpu.memory_space<vmem>>, vector<1x16x8xf32>
    %1 = vector.shape_cast %0 : vector<1x16x8xf32> to vector<16x8xf32>
    %c0_2 = arith.constant 0 : index
    %c0_3 = arith.constant 0 : index
    %2 = vector.load %arg2[%c0_2, %c0_3] : memref<8x4xf32, #tpu.memory_space<vmem>>, vector<8x4xf32>
    %cst = arith.constant dense<0.000000e+00> : vector<16x4xf32>
    %3 = tpu.matmul %1, %2, %cst {dimension_numbers = #tpu.dot_dimension_numbers<[1], [0], [0], [1], [0, 0, 1, 1], [], []>} : vector<16x8xf32>, vector<8x4xf32>, vector<16x4xf32> -> vector<16x4xf32>
    %c0_4 = arith.constant 0 : index
    %c0_5 = arith.constant 0 : index
    %4 = vector.load %arg3[%c0_4, %c0_5] : memref<1x4xf32, #tpu.memory_space<vmem>>, vector<1x4xf32>
    %5 = vector.broadcast %4 : vector<1x4xf32> to vector<16x4xf32>
    %6 = arith.addf %3, %5 : vector<16x4xf32>
    %c0_6 = arith.constant 0 : index
    %c0_7 = arith.constant 0 : index
    %7 = vector.load %arg6[%c0_6, %c0_7] : memref<4x4xf32, #tpu.memory_space<vmem>>, vector<4x4xf32>
    %c0_8 = arith.constant 0 : index
    %c0_9 = arith.constant 0 : index
    %8 = vector.load %arg4[%c0_8, %c0_9] : memref<1x4xf32, #tpu.memory_space<vmem>>, vector<1x4xf32>
    %c0_10 = arith.constant 0 : index
    %c0_11 = arith.constant 0 : index
    %9 = vector.load %arg5[%c0_10, %c0_11] : memref<1x4xf32, #tpu.memory_space<vmem>>, vector<1x4xf32>
    %cst_12 = arith.constant dense<0.000000e+00> : vector<16x4xf32>
    %10 = tpu.matmul %6, %7, %cst_12 {dimension_numbers = #tpu.dot_dimension_numbers<[1], [0], [0], [1], [0, 0, 1, 1], [], []>} : vector<16x4xf32>, vector<4x4xf32>, vector<16x4xf32> -> vector<16x4xf32>
    %11 = arith.subf %6, %10 : vector<16x4xf32>
    %12 = arith.mulf %11, %11 : vector<16x4xf32>
    %cst_13 = arith.constant dense<0.000000e+00> : vector<16x4xf32>
    %13 = tpu.matmul %12, %7, %cst_13 {dimension_numbers = #tpu.dot_dimension_numbers<[1], [0], [0], [1], [0, 0, 1, 1], [], []>} : vector<16x4xf32>, vector<4x4xf32>, vector<16x4xf32> -> vector<16x4xf32>
    %cst_14 = arith.constant 9.99999974E-6 : f32
    %14 = vector.broadcast %cst_14 : f32 to vector<16x4xf32>
    %15 = arith.addf %13, %14 : vector<16x4xf32>
    %16 = math.rsqrt %15 : vector<16x4xf32>
    %17 = arith.mulf %11, %16 : vector<16x4xf32>
    %18 = vector.broadcast %8 : vector<1x4xf32> to vector<16x4xf32>
    %19 = arith.mulf %17, %18 : vector<16x4xf32>
    %20 = vector.broadcast %9 : vector<1x4xf32> to vector<16x4xf32>
    %21 = arith.addf %19, %20 : vector<16x4xf32>
    %cst_15 = arith.constant 0.000000e+00 : f32
    %22 = vector.broadcast %cst_15 : f32 to vector<16x4xf32>
    %23 = arith.maximumf %21, %22 : vector<16x4xf32>
    %c0_16 = arith.constant 0 : index
    %c0_17 = arith.constant 0 : index
    %24 = vector.load %arg7[%c0_16, %c0_17] : memref<4x16xf32, #tpu.memory_space<vmem>>, vector<4x16xf32>
    %cst_18 = arith.constant dense<0.000000e+00> : vector<16x16xf32>
    %25 = tpu.matmul %23, %24, %cst_18 {dimension_numbers = #tpu.dot_dimension_numbers<[1], [0], [0], [1], [0, 0, 1, 1], [], []>} : vector<16x4xf32>, vector<4x16xf32>, vector<16x16xf32> -> vector<16x16xf32>
    %c0_19 = arith.constant 0 : index
    %c0_20 = arith.constant 0 : index
    %26 = vector.load %arg8[%c0_19, %c0_20] : memref<1x16xf32, #tpu.memory_space<vmem>>, vector<1x16xf32>
    %27 = vector.broadcast %26 : vector<1x16xf32> to vector<16x16xf32>
    %28 = arith.addf %25, %27 : vector<16x16xf32>
    %c0_21 = arith.constant 0 : index
    %c0_22 = arith.constant 0 : index
    %29 = vector.load %arg11[%c0_21, %c0_22] : memref<16x16xf32, #tpu.memory_space<vmem>>, vector<16x16xf32>
    %c0_23 = arith.constant 0 : index
    %c0_24 = arith.constant 0 : index
    %30 = vector.load %arg9[%c0_23, %c0_24] : memref<1x16xf32, #tpu.memory_space<vmem>>, vector<1x16xf32>
    %c0_25 = arith.constant 0 : index
    %c0_26 = arith.constant 0 : index
    %31 = vector.load %arg10[%c0_25, %c0_26] : memref<1x16xf32, #tpu.memory_space<vmem>>, vector<1x16xf32>
    %cst_27 = arith.constant dense<0.000000e+00> : vector<16x16xf32>
    %32 = tpu.matmul %28, %29, %cst_27 {dimension_numbers = #tpu.dot_dimension_numbers<[1], [0], [0], [1], [0, 0, 1, 1], [], []>} : vector<16x16xf32>, vector<16x16xf32>, vector<16x16xf32> -> vector<16x16xf32>
    %33 = arith.subf %28, %32 : vector<16x16xf32>
    %34 = arith.mulf %33, %33 : vector<16x16xf32>
    %cst_28 = arith.constant dense<0.000000e+00> : vector<16x16xf32>
    %35 = tpu.matmul %34, %29, %cst_28 {dimension_numbers = #tpu.dot_dimension_numbers<[1], [0], [0], [1], [0, 0, 1, 1], [], []>} : vector<16x16xf32>, vector<16x16xf32>, vector<16x16xf32> -> vector<16x16xf32>
    %cst_29 = arith.constant 9.99999974E-6 : f32
    %36 = vector.broadcast %cst_29 : f32 to vector<16x16xf32>
    %37 = arith.addf %35, %36 : vector<16x16xf32>
    %38 = math.rsqrt %37 : vector<16x16xf32>
    %39 = arith.mulf %33, %38 : vector<16x16xf32>
    %40 = vector.broadcast %30 : vector<1x16xf32> to vector<16x16xf32>
    %41 = arith.mulf %39, %40 : vector<16x16xf32>
    %42 = vector.broadcast %31 : vector<1x16xf32> to vector<16x16xf32>
    %43 = arith.addf %41, %42 : vector<16x16xf32>
    %cst_30 = arith.constant 0.000000e+00 : f32
    %44 = vector.broadcast %cst_30 : f32 to vector<16x16xf32>
    %45 = arith.maximumf %43, %44 : vector<16x16xf32>
    %c0_31 = arith.constant 0 : index
    %c0_32 = arith.constant 0 : index
    %46 = vector.load %arg12[%c0_31, %c0_32] : memref<80x16xf32, #tpu.memory_space<vmem>>, vector<80x16xf32>
    %cst_33 = arith.constant dense<0.000000e+00> : vector<80x16xf32>
    %47 = tpu.matmul %46, %45, %cst_33 {dimension_numbers = #tpu.dot_dimension_numbers<[1], [0], [0], [1], [0, 0, 1, 1], [], []>} : vector<80x16xf32>, vector<16x16xf32>, vector<80x16xf32> -> vector<80x16xf32>
    %c0_34 = arith.constant 0 : index
    %c0_35 = arith.constant 0 : index
    %c0_36 = arith.constant 0 : index
    %48 = vector.load %arg13[%c0_34, %c0_35, %c0_36] : memref<5x16x16xf32, #tpu.memory_space<vmem>>, vector<5x16x16xf32>
    %c0_37 = arith.constant 0 : index
    %c0_38 = arith.constant 0 : index
    %49 = vector.load %arg14[%c0_37, %c0_38] : memref<16x16xf32, #tpu.memory_space<vmem>>, vector<16x16xf32>
    %50 = vector.extract_strided_slice %47 {offsets = [0, 0], sizes = [16, 16], strides = [1, 1]} : vector<80x16xf32> to vector<16x16xf32>
    %51 = vector.extract_strided_slice %48 {offsets = [0, 0, 0], sizes = [1, 16, 16], strides = [1, 1, 1]} : vector<5x16x16xf32> to vector<1x16x16xf32>
    %52 = vector.shape_cast %51 : vector<1x16x16xf32> to vector<16x16xf32>
    %cst_39 = arith.constant dense<0.000000e+00> : vector<16x16xf32>
    %53 = tpu.matmul %50, %52, %cst_39 {dimension_numbers = #tpu.dot_dimension_numbers<[1], [0], [0], [1], [0, 0, 1, 1], [], []>} : vector<16x16xf32>, vector<16x16xf32>, vector<16x16xf32> -> vector<16x16xf32>
    %54 = arith.addf %49, %53 : vector<16x16xf32>
    %55 = vector.extract_strided_slice %47 {offsets = [16, 0], sizes = [16, 16], strides = [1, 1]} : vector<80x16xf32> to vector<16x16xf32>
    %56 = vector.extract_strided_slice %48 {offsets = [1, 0, 0], sizes = [1, 16, 16], strides = [1, 1, 1]} : vector<5x16x16xf32> to vector<1x16x16xf32>
    %57 = vector.shape_cast %56 : vector<1x16x16xf32> to vector<16x16xf32>
    %cst_40 = arith.constant dense<0.000000e+00> : vector<16x16xf32>
    %58 = tpu.matmul %55, %57, %cst_40 {dimension_numbers = #tpu.dot_dimension_numbers<[1], [0], [0], [1], [0, 0, 1, 1], [], []>} : vector<16x16xf32>, vector<16x16xf32>, vector<16x16xf32> -> vector<16x16xf32>
    %59 = arith.addf %54, %58 : vector<16x16xf32>
    %60 = vector.extract_strided_slice %47 {offsets = [32, 0], sizes = [16, 16], strides = [1, 1]} : vector<80x16xf32> to vector<16x16xf32>
    %61 = vector.extract_strided_slice %48 {offsets = [2, 0, 0], sizes = [1, 16, 16], strides = [1, 1, 1]} : vector<5x16x16xf32> to vector<1x16x16xf32>
    %62 = vector.shape_cast %61 : vector<1x16x16xf32> to vector<16x16xf32>
    %cst_41 = arith.constant dense<0.000000e+00> : vector<16x16xf32>
    %63 = tpu.matmul %60, %62, %cst_41 {dimension_numbers = #tpu.dot_dimension_numbers<[1], [0], [0], [1], [0, 0, 1, 1], [], []>} : vector<16x16xf32>, vector<16x16xf32>, vector<16x16xf32> -> vector<16x16xf32>
    %64 = arith.addf %59, %63 : vector<16x16xf32>
    %65 = vector.extract_strided_slice %47 {offsets = [48, 0], sizes = [16, 16], strides = [1, 1]} : vector<80x16xf32> to vector<16x16xf32>
    %66 = vector.extract_strided_slice %48 {offsets = [3, 0, 0], sizes = [1, 16, 16], strides = [1, 1, 1]} : vector<5x16x16xf32> to vector<1x16x16xf32>
    %67 = vector.shape_cast %66 : vector<1x16x16xf32> to vector<16x16xf32>
    %cst_42 = arith.constant dense<0.000000e+00> : vector<16x16xf32>
    %68 = tpu.matmul %65, %67, %cst_42 {dimension_numbers = #tpu.dot_dimension_numbers<[1], [0], [0], [1], [0, 0, 1, 1], [], []>} : vector<16x16xf32>, vector<16x16xf32>, vector<16x16xf32> -> vector<16x16xf32>
    %69 = arith.addf %64, %68 : vector<16x16xf32>
    %70 = vector.extract_strided_slice %47 {offsets = [64, 0], sizes = [16, 16], strides = [1, 1]} : vector<80x16xf32> to vector<16x16xf32>
    %71 = vector.extract_strided_slice %48 {offsets = [4, 0, 0], sizes = [1, 16, 16], strides = [1, 1, 1]} : vector<5x16x16xf32> to vector<1x16x16xf32>
    %72 = vector.shape_cast %71 : vector<1x16x16xf32> to vector<16x16xf32>
    %cst_43 = arith.constant dense<0.000000e+00> : vector<16x16xf32>
    %73 = tpu.matmul %70, %72, %cst_43 {dimension_numbers = #tpu.dot_dimension_numbers<[1], [0], [0], [1], [0, 0, 1, 1], [], []>} : vector<16x16xf32>, vector<16x16xf32>, vector<16x16xf32> -> vector<16x16xf32>
    %74 = arith.addf %69, %73 : vector<16x16xf32>
    %c0_44 = arith.constant 0 : index
    %c0_45 = arith.constant 0 : index
    %c0_46 = arith.constant 0 : index
    %75 = vector.load %arg15[%c0_44, %c0_45, %c0_46] : memref<1x16x16xf32, #tpu.memory_space<vmem>>, vector<1x16x16xf32>
    %76 = vector.shape_cast %75 : vector<1x16x16xf32> to vector<16x16xf32>
    %77 = vector.shape_cast %74 : vector<16x16xf32> to vector<1x16x16xf32>
    tpu.vector_store %arg15[%c0_44, %c0_45, %c0_46], %77 {strides = array<i32>} : memref<1x16x16xf32, #tpu.memory_space<vmem>>, vector<1x16x16xf32>,
    return
  }
  func.func @transform_0(%arg0: i32) -> (i32, i32, i32) {
    %c0_i32 = arith.constant 0 : i32
    %c0_i32_0 = arith.constant 0 : i32
    %c0_i32_1 = arith.constant 0 : i32
    return %arg0, %c0_i32, %c0_i32_0 : i32, i32, i32
  }
  func.func @transform_1(%arg0: i32) -> (i32, i32) {
    %c0_i32 = arith.constant 0 : i32
    %c0_i32_0 = arith.constant 0 : i32
    %c0_i32_1 = arith.constant 0 : i32
    return %c0_i32, %c0_i32_0 : i32, i32
  }
  func.func @transform_2(%arg0: i32) -> (i32, i32) {
    %c0_i32 = arith.constant 0 : i32
    %c0_i32_0 = arith.constant 0 : i32
    %c0_i32_1 = arith.constant 0 : i32
    return %c0_i32, %c0_i32_0 : i32, i32
  }
  func.func @transform_3(%arg0: i32) -> (i32, i32) {
    %c0_i32 = arith.constant 0 : i32
    %c0_i32_0 = arith.constant 0 : i32
    %c0_i32_1 = arith.constant 0 : i32
    return %c0_i32, %c0_i32_0 : i32, i32
  }
  func.func @transform_4(%arg0: i32) -> (i32, i32) {
    %c0_i32 = arith.constant 0 : i32
    %c0_i32_0 = arith.constant 0 : i32
    %c0_i32_1 = arith.constant 0 : i32
    return %c0_i32, %c0_i32_0 : i32, i32
  }
  func.func @transform_5(%arg0: i32) -> (i32, i32) {
    %c0_i32 = arith.constant 0 : i32
    %c0_i32_0 = arith.constant 0 : i32
    %c0_i32_1 = arith.constant 0 : i32
    return %c0_i32, %c0_i32_0 : i32, i32
  }
  func.func @transform_6(%arg0: i32) -> (i32, i32) {
    %c0_i32 = arith.constant 0 : i32
    %c0_i32_0 = arith.constant 0 : i32
    %c0_i32_1 = arith.constant 0 : i32
    return %c0_i32, %c0_i32_0 : i32, i32
  }
  func.func @transform_7(%arg0: i32) -> (i32, i32) {
    %c0_i32 = arith.constant 0 : i32
    %c0_i32_0 = arith.constant 0 : i32
    %c0_i32_1 = arith.constant 0 : i32
    return %c0_i32, %c0_i32_0 : i32, i32
  }
  func.func @transform_8(%arg0: i32) -> (i32, i32) {
    %c0_i32 = arith.constant 0 : i32
    %c0_i32_0 = arith.constant 0 : i32
    %c0_i32_1 = arith.constant 0 : i32
    return %c0_i32, %c0_i32_0 : i32, i32
  }
  func.func @transform_9(%arg0: i32) -> (i32, i32) {
    %c0_i32 = arith.constant 0 : i32
    %c0_i32_0 = arith.constant 0 : i32
    %c0_i32_1 = arith.constant 0 : i32
    return %c0_i32, %c0_i32_0 : i32, i32
  }
  func.func @transform_10(%arg0: i32) -> (i32, i32) {
    %c0_i32 = arith.constant 0 : i32
    %c0_i32_0 = arith.constant 0 : i32
    %c0_i32_1 = arith.constant 0 : i32
    return %c0_i32, %c0_i32_0 : i32, i32
  }
  func.func @transform_11(%arg0: i32) -> (i32, i32) {
    %c0_i32 = arith.constant 0 : i32
    %c0_i32_0 = arith.constant 0 : i32
    %c0_i32_1 = arith.constant 0 : i32
    return %c0_i32, %c0_i32_0 : i32, i32
  }
  func.func @transform_12(%arg0: i32) -> (i32, i32, i32) {
    %c0_i32 = arith.constant 0 : i32
    %c0_i32_0 = arith.constant 0 : i32
    %c0_i32_1 = arith.constant 0 : i32
    %c0_i32_2 = arith.constant 0 : i32
    return %c0_i32, %c0_i32_0, %c0_i32_1 : i32, i32, i32
  }
  func.func @transform_13(%arg0: i32) -> (i32, i32) {
    %c0_i32 = arith.constant 0 : i32
    %c0_i32_0 = arith.constant 0 : i32
    %c0_i32_1 = arith.constant 0 : i32
    return %c0_i32, %c0_i32_0 : i32, i32
  }
  func.func @transform_14(%arg0: i32) -> (i32, i32, i32) {
    %c0_i32 = arith.constant 0 : i32
    %c0_i32_0 = arith.constant 0 : i32
    %c0_i32_1 = arith.constant 0 : i32
    return %arg0, %c0_i32, %c0_i32_0 : i32, i32, i32
  }
}

module attributes {stable_mosaic.version = 11 : i64} {
  func.func @kernel(%arg0: i32, %arg1: memref<1x16x8xf32, #tpu.memory_space<vmem>>, %arg2: memref<8x4xf32, #tpu.memory_space<vmem>>, %arg3: memref<1x4xf32, #tpu.memory_space<vmem>>, %arg4: memref<1x4xf32, #tpu.memory_space<vmem>>, %arg5: memref<1x4xf32, #tpu.memory_space<vmem>>, %arg6: memref<4x4xf32, #tpu.memory_space<vmem>>, %arg7: memref<4x16xf32, #tpu.memory_space<vmem>>, %arg8: memref<1x16xf32, #tpu.memory_space<vmem>>, %arg9: memref<1x16xf32, #tpu.memory_space<vmem>>, %arg10: memref<1x16xf32, #tpu.memory_space<vmem>>, %arg11: memref<16x16xf32, #tpu.memory_space<vmem>>, %arg12: memref<80x16xf32, #tpu.memory_space<vmem>>, %arg13: memref<5x16x16xf32, #tpu.memory_space<vmem>>, %arg14: memref<16x16xf32, #tpu.memory_space<vmem>>, %arg15: memref<1x16x16xf32, #tpu.memory_space<vmem>>) attributes {dimension_semantics = [#tpu.dimension_semantics<parallel>], iteration_bounds = array<i64: 2>, scalar_prefetch = 0 : i64, scratch_operands = 0 : i64, tpu.core_type = #tpu.core_type<tc>, window_params = [{transform_indices = @transform_0, window_bounds = array<i64: 1, 16, 8>}, {pipeline_mode = #tpu.pipeline_mode<synchronous>, transform_indices = @transform_1, window_bounds = array<i64: 8, 4>}, {pipeline_mode = #tpu.pipeline_mode<synchronous>, transform_indices = @transform_2, window_bounds = array<i64: 1, 4>}, {pipeline_mode = #tpu.pipeline_mode<synchronous>, transform_indices = @transform_3, window_bounds = array<i64: 1, 4>}, {pipeline_mode = #tpu.pipeline_mode<synchronous>, transform_indices = @transform_4, window_bounds = array<i64: 1, 4>}, {pipeline_mode = #tpu.pipeline_mode<synchronous>, transform_indices = @transform_5, window_bounds = array<i64: 4, 4>}, {pipeline_mode = #tpu.pipeline_mode<synchronous>, transform_indices = @transform_6, window_bounds = array<i64: 4, 16>}, {pipeline_mode = #tpu.pipeline_mode<synchronous>, transform_indices = @transform_7, window_bounds = array<i64: 1, 16>}, {pipeline_mode = #tpu.pipeline_mode<synchronous>, transform_indices = @transform_8, window_bounds = array<i64: 1, 16>}, {pipeline_mode = #tpu.pipeline_mode<synchronous>, transform_indices = @transform_9, window_bounds = array<i64: 1, 16>}, {pipeline_mode = #tpu.pipeline_mode<synchronous>, transform_indices = @transform_10, window_bounds = array<i64: 16, 16>}, {pipeline_mode = #tpu.pipeline_mode<synchronous>, transform_indices = @transform_11, window_bounds = array<i64: 80, 16>}, {pipeline_mode = #tpu.pipeline_mode<synchronous>, transform_indices = @transform_12, window_bounds = array<i64: 5, 16, 16>}, {pipeline_mode = #tpu.pipeline_mode<synchronous>, transform_indices = @transform_13, window_bounds = array<i64: 16, 16>}, {transform_indices = @transform_14, window_bounds = array<i64: 1, 16, 16>}]} {
    %c0 = arith.constant 0 : index
    %c0_0 = arith.constant 0 : index
    %c0_1 = arith.constant 0 : index
    %0 = vector.load %arg1[%c0, %c0_0, %c0_1] : memref<1x16x8xf32, #tpu.memory_space<vmem>>, vector<1x16x8xf32>
    %1 = vector.shape_cast %0 : vector<1x16x8xf32> to vector<16x8xf32>
    %c0_2 = arith.constant 0 : index
    %c0_3 = arith.constant 0 : index
    %2 = vector.load %arg2[%c0_2, %c0_3] : memref<8x4xf32, #tpu.memory_space<vmem>>, vector<8x4xf32>
    %cst = arith.constant dense<0.000000e+00> : vector<16x4xf32>
    %3 = tpu.matmul %1, %2, %cst {dimension_numbers = #tpu.dot_dimension_numbers<[1], [0], [0], [1], [0, 0, 1, 1], [], []>} : vector<16x8xf32>, vector<8x4xf32>, vector<16x4xf32> -> vector<16x4xf32>
    %c0_4 = arith.constant 0 : index
    %c0_5 = arith.constant 0 : index
    %4 = vector.load %arg3[%c0_4, %c0_5] : memref<1x4xf32, #tpu.memory_space<vmem>>, vector<1x4xf32>
    %5 = vector.broadcast %4 : vector<1x4xf32> to vector<16x4xf32>
    %6 = arith.addf %3, %5 : vector<16x4xf32>
    %c0_6 = arith.constant 0 : index
    %c0_7 = arith.constant 0 : index
    %7 = vector.load %arg6[%c0_6, %c0_7] : memref<4x4xf32, #tpu.memory_space<vmem>>, vector<4x4xf32>
    %c0_8 = arith.constant 0 : index
    %c0_9 = arith.constant 0 : index
    %8 = vector.load %arg4[%c0_8, %c0_9] : memref<1x4xf32, #tpu.memory_space<vmem>>, vector<1x4xf32>
    %c0_10 = arith.constant 0 : index
    %c0_11 = arith.constant 0 : index
    %9 = vector.load %arg5[%c0_10, %c0_11] : memref<1x4xf32, #tpu.memory_space<vmem>>, vector<1x4xf32>
    %cst_12 = arith.constant dense<0.000000e+00> : vector<16x4xf32>
    %10 = tpu.matmul %6, %7, %cst_12 {dimension_numbers = #tpu.dot_dimension_numbers<[1], [0], [0], [1], [0, 0, 1, 1], [], []>} : vector<16x4xf32>, vector<4x4xf32>, vector<16x4xf32> -> vector<16x4xf32>
    %11 = arith.subf %6, %10 : vector<16x4xf32>
    %12 = arith.mulf %11, %11 : vector<16x4xf32>
    %cst_13 = arith.constant dense<0.000000e+00> : vector<16x4xf32>
    %13 = tpu.matmul %12, %7, %cst_13 {dimension_numbers = #tpu.dot_dimension_numbers<[1], [0], [0], [1], [0, 0, 1, 1], [], []>} : vector<16x4xf32>, vector<4x4xf32>, vector<16x4xf32> -> vector<16x4xf32>
    %cst_14 = arith.constant 9.99999974E-6 : f32
    %14 = vector.broadcast %cst_14 : f32 to vector<16x4xf32>
    %15 = arith.addf %13, %14 : vector<16x4xf32>
    %16 = math.rsqrt %15 : vector<16x4xf32>
    %17 = arith.mulf %11, %16 : vector<16x4xf32>
    %18 = vector.broadcast %8 : vector<1x4xf32> to vector<16x4xf32>
    %19 = arith.mulf %17, %18 : vector<16x4xf32>
    %20 = vector.broadcast %9 : vector<1x4xf32> to vector<16x4xf32>
    %21 = arith.addf %19, %20 : vector<16x4xf32>
    %cst_15 = arith.constant 0.000000e+00 : f32
    %22 = vector.broadcast %cst_15 : f32 to vector<16x4xf32>
    %23 = arith.maximumf %21, %22 : vector<16x4xf32>
    %c0_16 = arith.constant 0 : index
    %c0_17 = arith.constant 0 : index
    %24 = vector.load %arg7[%c0_16, %c0_17] : memref<4x16xf32, #tpu.memory_space<vmem>>, vector<4x16xf32>
    %cst_18 = arith.constant dense<0.000000e+00> : vector<16x16xf32>
    %25 = tpu.matmul %23, %24, %cst_18 {dimension_numbers = #tpu.dot_dimension_numbers<[1], [0], [0], [1], [0, 0, 1, 1], [], []>} : vector<16x4xf32>, vector<4x16xf32>, vector<16x16xf32> -> vector<16x16xf32>
    %c0_19 = arith.constant 0 : index
    %c0_20 = arith.constant 0 : index
    %26 = vector.load %arg8[%c0_19, %c0_20] : memref<1x16xf32, #tpu.memory_space<vmem>>, vector<1x16xf32>
    %27 = vector.broadcast %26 : vector<1x16xf32> to vector<16x16xf32>
    %28 = arith.addf %25, %27 : vector<16x16xf32>
    %c0_21 = arith.constant 0 : index
    %c0_22 = arith.constant 0 : index
    %29 = vector.load %arg11[%c0_21, %c0_22] : memref<16x16xf32, #tpu.memory_space<vmem>>, vector<16x16xf32>
    %c0_23 = arith.constant 0 : index
    %c0_24 = arith.constant 0 : index
    %30 = vector.load %arg9[%c0_23, %c0_24] : memref<1x16xf32, #tpu.memory_space<vmem>>, vector<1x16xf32>
    %c0_25 = arith.constant 0 : index
    %c0_26 = arith.constant 0 : index
    %31 = vector.load %arg10[%c0_25, %c0_26] : memref<1x16xf32, #tpu.memory_space<vmem>>, vector<1x16xf32>
    %cst_27 = arith.constant dense<0.000000e+00> : vector<16x16xf32>
    %32 = tpu.matmul %28, %29, %cst_27 {dimension_numbers = #tpu.dot_dimension_numbers<[1], [0], [0], [1], [0, 0, 1, 1], [], []>} : vector<16x16xf32>, vector<16x16xf32>, vector<16x16xf32> -> vector<16x16xf32>
    %33 = arith.subf %28, %32 : vector<16x16xf32>
    %34 = arith.mulf %33, %33 : vector<16x16xf32>
    %cst_28 = arith.constant dense<0.000000e+00> : vector<16x16xf32>
    %35 = tpu.matmul %34, %29, %cst_28 {dimension_numbers = #tpu.dot_dimension_numbers<[1], [0], [0], [1], [0, 0, 1, 1], [], []>} : vector<16x16xf32>, vector<16x16xf32>, vector<16x16xf32> -> vector<16x16xf32>
    %cst_29 = arith.constant 9.99999974E-6 : f32
    %36 = vector.broadcast %cst_29 : f32 to vector<16x16xf32>
    %37 = arith.addf %35, %36 : vector<16x16xf32>
    %38 = math.rsqrt %37 : vector<16x16xf32>
    %39 = arith.mulf %33, %38 : vector<16x16xf32>
    %40 = vector.broadcast %30 : vector<1x16xf32> to vector<16x16xf32>
    %41 = arith.mulf %39, %40 : vector<16x16xf32>
    %42 = vector.broadcast %31 : vector<1x16xf32> to vector<16x16xf32>
    %43 = arith.addf %41, %42 : vector<16x16xf32>
    %cst_30 = arith.constant 0.000000e+00 : f32
    %44 = vector.broadcast %cst_30 : f32 to vector<16x16xf32>
    %45 = arith.maximumf %43, %44 : vector<16x16xf32>
    %c0_31 = arith.constant 0 : index
    %c0_32 = arith.constant 0 : index
    %46 = vector.load %arg12[%c0_31, %c0_32] : memref<80x16xf32, #tpu.memory_space<vmem>>, vector<80x16xf32>
    %cst_33 = arith.constant dense<0.000000e+00> : vector<80x16xf32>
    %47 = tpu.matmul %46, %45, %cst_33 {dimension_numbers = #tpu.dot_dimension_numbers<[1], [0], [0], [1], [0, 0, 1, 1], [], []>} : vector<80x16xf32>, vector<16x16xf32>, vector<80x16xf32> -> vector<80x16xf32>
    %c0_34 = arith.constant 0 : index
    %c0_35 = arith.constant 0 : index
    %c0_36 = arith.constant 0 : index
    %48 = vector.load %arg13[%c0_34, %c0_35, %c0_36] : memref<5x16x16xf32, #tpu.memory_space<vmem>>, vector<5x16x16xf32>
    %c0_37 = arith.constant 0 : index
    %c0_38 = arith.constant 0 : index
    %49 = vector.load %arg14[%c0_37, %c0_38] : memref<16x16xf32, #tpu.memory_space<vmem>>, vector<16x16xf32>
    %50 = vector.extract_strided_slice %47 {offsets = [0, 0], sizes = [16, 16], strides = [1, 1]} : vector<80x16xf32> to vector<16x16xf32>
    %51 = vector.extract_strided_slice %48 {offsets = [0, 0, 0], sizes = [1, 16, 16], strides = [1, 1, 1]} : vector<5x16x16xf32> to vector<1x16x16xf32>
    %52 = vector.shape_cast %51 : vector<1x16x16xf32> to vector<16x16xf32>
    %cst_39 = arith.constant dense<0.000000e+00> : vector<16x16xf32>
    %53 = tpu.matmul %50, %52, %cst_39 {dimension_numbers = #tpu.dot_dimension_numbers<[1], [0], [0], [1], [0, 0, 1, 1], [], []>} : vector<16x16xf32>, vector<16x16xf32>, vector<16x16xf32> -> vector<16x16xf32>
    %54 = arith.addf %49, %53 : vector<16x16xf32>
    %55 = vector.extract_strided_slice %47 {offsets = [16, 0], sizes = [16, 16], strides = [1, 1]} : vector<80x16xf32> to vector<16x16xf32>
    %56 = vector.extract_strided_slice %48 {offsets = [1, 0, 0], sizes = [1, 16, 16], strides = [1, 1, 1]} : vector<5x16x16xf32> to vector<1x16x16xf32>
    %57 = vector.shape_cast %56 : vector<1x16x16xf32> to vector<16x16xf32>
    %cst_40 = arith.constant dense<0.000000e+00> : vector<16x16xf32>
    %58 = tpu.matmul %55, %57, %cst_40 {dimension_numbers = #tpu.dot_dimension_numbers<[1], [0], [0], [1], [0, 0, 1, 1], [], []>} : vector<16x16xf32>, vector<16x16xf32>, vector<16x16xf32> -> vector<16x16xf32>
    %59 = arith.addf %54, %58 : vector<16x16xf32>
    %60 = vector.extract_strided_slice %47 {offsets = [32, 0], sizes = [16, 16], strides = [1, 1]} : vector<80x16xf32> to vector<16x16xf32>
    %61 = vector.extract_strided_slice %48 {offsets = [2, 0, 0], sizes = [1, 16, 16], strides = [1, 1, 1]} : vector<5x16x16xf32> to vector<1x16x16xf32>
    %62 = vector.shape_cast %61 : vector<1x16x16xf32> to vector<16x16xf32>
    %cst_41 = arith.constant dense<0.000000e+00> : vector<16x16xf32>
    %63 = tpu.matmul %60, %62, %cst_41 {dimension_numbers = #tpu.dot_dimension_numbers<[1], [0], [0], [1], [0, 0, 1, 1], [], []>} : vector<16x16xf32>, vector<16x16xf32>, vector<16x16xf32> -> vector<16x16xf32>
    %64 = arith.addf %59, %63 : vector<16x16xf32>
    %65 = vector.extract_strided_slice %47 {offsets = [48, 0], sizes = [16, 16], strides = [1, 1]} : vector<80x16xf32> to vector<16x16xf32>
    %66 = vector.extract_strided_slice %48 {offsets = [3, 0, 0], sizes = [1, 16, 16], strides = [1, 1, 1]} : vector<5x16x16xf32> to vector<1x16x16xf32>
    %67 = vector.shape_cast %66 : vector<1x16x16xf32> to vector<16x16xf32>
    %cst_42 = arith.constant dense<0.000000e+00> : vector<16x16xf32>
    %68 = tpu.matmul %65, %67, %cst_42 {dimension_numbers = #tpu.dot_dimension_numbers<[1], [0], [0], [1], [0, 0, 1, 1], [], []>} : vector<16x16xf32>, vector<16x16xf32>, vector<16x16xf32> -> vector<16x16xf32>
    %69 = arith.addf %64, %68 : vector<16x16xf32>
    %70 = vector.extract_strided_slice %47 {offsets = [64, 0], sizes = [16, 16], strides = [1, 1]} : vector<80x16xf32> to vector<16x16xf32>
    %71 = vector.extract_strided_slice %48 {offsets = [4, 0, 0], sizes = [1, 16, 16], strides = [1, 1, 1]} : vector<5x16x16xf32> to vector<1x16x16xf32>
    %72 = vector.shape_cast %71 : vector<1x16x16xf32> to vector<16x16xf32>
    %cst_43 = arith.constant dense<0.000000e+00> : vector<16x16xf32>
    %73 = tpu.matmul %70, %72, %cst_43 {dimension_numbers = #tpu.dot_dimension_numbers<[1], [0], [0], [1], [0, 0, 1, 1], [], []>} : vector<16x16xf32>, vector<16x16xf32>, vector<16x16xf32> -> vector<16x16xf32>
    %74 = arith.addf %69, %73 : vector<16x16xf32>
    %c0_44 = arith.constant 0 : index
    %c0_45 = arith.constant 0 : index
    %c0_46 = arith.constant 0 : index
    %75 = vector.load %arg15[%c0_44, %c0_45, %c0_46] : memref<1x16x16xf32, #tpu.memory_space<vmem>>, vector<1x16x16xf32>
    %76 = vector.shape_cast %75 : vector<1x16x16xf32> to vector<16x16xf32>
    %77 = vector.shape_cast %74 : vector<16x16xf32> to vector<1x16x16xf32>
    tpu.vector_store %arg15[%c0_44, %c0_45, %c0_46], %77 {strides = array<i32>} : memref<1x16x16xf32, #tpu.memory_space<vmem>>, vector<1x16x16xf32>,
    return
  }
  func.func @transform_0(%arg0: i32) -> (i32, i32, i32) {
    %c0_i32 = arith.constant 0 : i32
    %c0_i32_0 = arith.constant 0 : i32
    %c0_i32_1 = arith.constant 0 : i32
    return %arg0, %c0_i32, %c0_i32_0 : i32, i32, i32
  }
  func.func @transform_1(%arg0: i32) -> (i32, i32) {
    %c0_i32 = arith.constant 0 : i32
    %c0_i32_0 = arith.constant 0 : i32
    %c0_i32_1 = arith.constant 0 : i32
    return %c0_i32, %c0_i32_0 : i32, i32
  }
  func.func @transform_2(%arg0: i32) -> (i32, i32) {
    %c0_i32 = arith.constant 0 : i32
    %c0_i32_0 = arith.constant 0 : i32
    %c0_i32_1 = arith.constant 0 : i32
    return %c0_i32, %c0_i32_0 : i32, i32
  }
  func.func @transform_3(%arg0: i32) -> (i32, i32) {
    %c0_i32 = arith.constant 0 : i32
    %c0_i32_0 = arith.constant 0 : i32
    %c0_i32_1 = arith.constant 0 : i32
    return %c0_i32, %c0_i32_0 : i32, i32
  }
  func.func @transform_4(%arg0: i32) -> (i32, i32) {
    %c0_i32 = arith.constant 0 : i32
    %c0_i32_0 = arith.constant 0 : i32
    %c0_i32_1 = arith.constant 0 : i32
    return %c0_i32, %c0_i32_0 : i32, i32
  }
  func.func @transform_5(%arg0: i32) -> (i32, i32) {
    %c0_i32 = arith.constant 0 : i32
    %c0_i32_0 = arith.constant 0 : i32
    %c0_i32_1 = arith.constant 0 : i32
    return %c0_i32, %c0_i32_0 : i32, i32
  }
  func.func @transform_6(%arg0: i32) -> (i32, i32) {
    %c0_i32 = arith.constant 0 : i32
    %c0_i32_0 = arith.constant 0 : i32
    %c0_i32_1 = arith.constant 0 : i32
    return %c0_i32, %c0_i32_0 : i32, i32
  }
  func.func @transform_7(%arg0: i32) -> (i32, i32) {
    %c0_i32 = arith.constant 0 : i32
    %c0_i32_0 = arith.constant 0 : i32
    %c0_i32_1 = arith.constant 0 : i32
    return %c0_i32, %c0_i32_0 : i32, i32
  }
  func.func @transform_8(%arg0: i32) -> (i32, i32) {
    %c0_i32 = arith.constant 0 : i32
    %c0_i32_0 = arith.constant 0 : i32
    %c0_i32_1 = arith.constant 0 : i32
    return %c0_i32, %c0_i32_0 : i32, i32
  }
  func.func @transform_9(%arg0: i32) -> (i32, i32) {
    %c0_i32 = arith.constant 0 : i32
    %c0_i32_0 = arith.constant 0 : i32
    %c0_i32_1 = arith.constant 0 : i32
    return %c0_i32, %c0_i32_0 : i32, i32
  }
  func.func @transform_10(%arg0: i32) -> (i32, i32) {
    %c0_i32 = arith.constant 0 : i32
    %c0_i32_0 = arith.constant 0 : i32
    %c0_i32_1 = arith.constant 0 : i32
    return %c0_i32, %c0_i32_0 : i32, i32
  }
  func.func @transform_11(%arg0: i32) -> (i32, i32) {
    %c0_i32 = arith.constant 0 : i32
    %c0_i32_0 = arith.constant 0 : i32
    %c0_i32_1 = arith.constant 0 : i32
    return %c0_i32, %c0_i32_0 : i32, i32
  }
  func.func @transform_12(%arg0: i32) -> (i32, i32, i32) {
    %c0_i32 = arith.constant 0 : i32
    %c0_i32_0 = arith.constant 0 : i32
    %c0_i32_1 = arith.constant 0 : i32
    %c0_i32_2 = arith.constant 0 : i32
    return %c0_i32, %c0_i32_0, %c0_i32_1 : i32, i32, i32
  }
  func.func @transform_13(%arg0: i32) -> (i32, i32) {
    %c0_i32 = arith.constant 0 : i32
    %c0_i32_0 = arith.constant 0 : i32
    %c0_i32_1 = arith.constant 0 : i32
    return %c0_i32, %c0_i32_0 : i32, i32
  }
  func.func @transform_14(%arg0: i32) -> (i32, i32, i32) {
    %c0_i32 = arith.constant 0 : i32
    %c0_i32_0 = arith.constant 0 : i32
    %c0_i32_1 = arith.constant 0 : i32
    return %arg0, %c0_i32, %c0_i32_0 : i32, i32, i32
  }
}

</mosaic_0001>

<bundles_post_ra>
// kernel: tpu_custom_call.1
= control target key start
LH: loop header
LB: loop body
LE: loop exit
PB: predicated region body
PF: predicated region fallthrough
CT: control target
= control target key end

     0   :  { %s2322_s0 = inlined_call_operand.vmem [shape: f32[2,16,8], index: 0, kind: input, shape index: {}]   ;;  %s2323_s1 = inlined_call_operand.vmem [shape: f32[8,4], index: 1, kind: input, shape index: {}]   ;;  %s2324_s2 = inlined_call_operand.vmem [shape: f32[1,4], index: 2, kind: input, shape index: {}]   ;;  %s2325_s3 = inlined_call_operand.vmem [shape: f32[1,4], index: 3, kind: input, shape index: {}]   ;;  %s2326_s4 = inlined_call_operand.vmem [shape: f32[1,4], index: 4, kind: input, shape index: {}]   ;;  %s2327_s5 = inlined_call_operand.vmem [shape: f32[4,4], index: 5, kind: input, shape index: {}]   ;;  %s2328_s6 = inlined_call_operand.vmem [shape: f32[4,16], index: 6, kind: input, shape index: {}]   ;;  %s2329_s7 = inlined_call_operand.vmem [shape: f32[1,16], index: 7, kind: input, shape index: {}]   ;;  %s2330_s8 = inlined_call_operand.vmem [shape: f32[1,16], index: 8, kind: input, shape index: {}]   ;;  %s2331_s9 = inlined_call_operand.vmem [shape: f32[1,16], index: 9, kind: input, shape index: {}]   ;;  %s2332_s10 = inlined_call_operand.vmem [shape: f32[16,16], index: 10, kind: input, shape index: {}]   ;;  %s2333_s11 = inlined_call_operand.vmem [shape: f32[80,16], index: 11, kind: input, shape index: {}]   ;;  %s2334_s12 = inlined_call_operand.vmem [shape: f32[5,16,16], index: 12, kind: input, shape index: {}]   ;;  %s2335_s13 = inlined_call_operand.vmem [shape: f32[16,16], index: 13, kind: input, shape index: {}]   ;;  %s2336_s14 = inlined_call_operand.hbm [shape: f32[2,16,16], index: 14, kind: output, shape index: {}]  }
   0x1   :  { %2338 = sst [smem:[#allocation7_spill]] %s2322_s0 }
   0x2   :  { %2339 = sst [smem:[#allocation8_spill]] %s2323_s1 }
   0x3   :  { %19 = vsyncpa [#allocation3], 0 }
   0x4   :  { %21 = vsyncpa [#allocation3 + $0x1], 0  ;;  %s2083_s29 = smov 0   ;;  %s2085_s30 = smov 0  }
   0x5   :  { %s2087_s15 = smov 0   ;;  %s2089_s16 = smov 0  }
   0x6 LB: > { %2340 = sst [smem:[#allocation5_spill]] %s1999_s15  ;;  %s2104_s17 = sadd.s32 4294967295, %s2003_s16   ;;  %s2003_s16 = sphi %s2089_s16, %s2350_s16   ;;  %s1999_s15 = sphi %s2087_s15, %s2347_s15   ;;  %s1995_s30 = sphi %s2085_s30, %s2349_s30   ;;  %s1991_s29 = sphi %s2083_s29, %s2348_s29  }
   0x7   : > { %s1699_s18 = sadd.s32 4294967294, %s2003_s16   ;;  %s2108_s19 = sadd.s32 1, %s2003_s16  }
   0x8   : > { %s333_s20 = sadd.s32 1, %s1999_s15  ;;  %s330_s21 = ssub.s32 %s2003_s16, %s2108_s19 }
   0x9   : > { %p343_p0 = scmp.ne.s32.totalorder %s1999_s15, %s1995_s30  ;;  %p331_p1 = scmp.eq.s32.totalorder %s330_s21, 0 }
   0xa   : > { %p344_p2 = scmp.eq.s32.totalorder %s2104_s17, 1  ;;  %p349_p3 = scmp.ne.s32.totalorder %s1995_s30, %s1991_s29 }
   0xb   : > { %p350_p4 = scmp.eq.s32.totalorder %s1699_s18, 1  ;;  %p1702_p7 = scmp.ge.s32.totalorder %s2003_s16, 1 }
   0xc   : > { %s2119_s22 = scalar_select %p331_p1, %s1999_s15, %s333_s20  }
   0xd   : > { %p2121_p5 = por %p344_p2, %p343_p0  ;;  %p2125_p6 = por %p350_p4, %p349_p3 }
   0xe   : > { %2341 = sst [smem:[#allocation6_spill]] %s2119_s22  ;;  %p415_p8 = scmp.lt.s32.totalorder %s2003_s16, 3 }
  0x10   : > { %p416_p9 = pnand %p1702_p7, %p415_p8 }
  0x11   : > { %s2344_s1 = sld [smem:[#allocation8_spill]] (!%p416_p9)  ;;  %p461_p10 = scmp.lt.s32.totalorder (!%p416_p9), %s2104_s17, 1 }
  0x12   : > { %419 = sbr.rel (%p416_p9) target bundleno = 1689 (0x699), region = 76  ;;  %s2345_s0 = sld [smem:[#allocation7_spill]] (!%p416_p9) }
  0x13   : > { %s458_s18 = sand.u32 (!%p416_p9), 1, %s1995_s30   ;;  %s1753_s22 = sshll.u32 (!%p416_p9), %s2104_s17, 8 }
  0x14   : > { %s1703_s25 = sshll.u32 (!%p416_p9), %s458_s18, 4  ;;  %s2278_s20 = scalar_lea.hbm (!%p416_p9), %s2336_s14, %s1753_s22 }
  0x15   : > { %s460_s26 = scalar_lea.vmem (!%p416_p9), [#allocation2], %s1703_s25  ;;  %s2005_s25 = smov (!%p416_p9), [#allocation2]  }
  0x16   : > { %s1637_s15 = sshll.u32 (!%p416_p9), %s460_s26, 4  ;;  %s2273_s15 = int_to_ptr.vmem [resolvable:$true] %s1637_s15 }
  0x17   : > { %v468_v0 = vld [vmem:[%s2344_s1] sm:$0xff]  ;;  %s462_s27 = scalar_select %p461_p10, %s2104_s17, 1  ;;  %vm476_vm0 = vcmask 64512   ;;  %vm568_vm1 = vcmask 1043456   ;;  %vm561_vm2 = vcmask 31744   ;;  %v847_v32 = vld [vmem:[%s2332_s10 + $0x8] sm:$0xff] }
  0x18   : > { %1806 = vmatprep.subr.mxu0 %v468_v0  ;;  %v558_v3 = vld [vmem:[%s2327_s5] sm:$0xf]  ;;  %vm850_vm3 = vcmask 130048   ;;  %v1040_v62 = vld [vmem:[%s2333_s11 + $0x8] sm:$0xff]  ;;  %v1041_v63 = vld [vmem:[%s2333_s11 + $0x10] sm:$0xff]  ;;  %s2282_s17 = scalar_lea.sflag [#allocation3], %s458_s18 }
  0x19   : > { %1807 = vmatpush3.msra.mxu0 %v468_v0  ;;  %s1752_s28 = sshll.u32 %s462_s27, 4  ;;  %1811 = vmatprep.subr.msk.mxu1 %vm568_vm1, %v558_v3  ;;  %v1706_v5 = vld [vmem:[%s2324_s2] ss:$0 sm:$0xff]  ;;  %v1042_v0 = vld [vmem:[%s2333_s11 + $0x18] sm:$0xff] }
  0x1a   : > { %s465_s21 = scalar_lea.vmem %s2345_s0, %s1752_s28  ;;  %1816 = vmatprep.subr.msk.mxu0 %vm568_vm1, %v558_v3  ;;  %1812 = vmatpush3.msk.msra.mxu1 %vm568_vm1, %v558_v3  ;;  %v754_v15 = vld [vmem:[%s2328_s6] sm:$0xf]  ;;  %s1947_s0 = sshll.u32 %s2005_s25, 4  ;;  %s1948_s0 = int_to_ptr.vmem [resolvable:$false] %s1947_s0 }
  0x1b   : > { %v466_v1 = vld [vmem:[%s465_s21] sm:$0xff]  ;;  %v467_v2 = vld [vmem:[%s465_s21 + $0x8] sm:$0xff]  ;;  %1821 = vmatprep.subr.msk.mxu1 %vm568_vm1, %v754_v15  ;;  %s1943_s21 = scalar_lea.vmem %s2273_s15, 256  ;;  %s1949_s1 = scalar_lea.vmem %s1948_s0, 512 }
  0x1c   : > { %1808 = vmatprep.mubr.msk.f32.mxu0 %vm476_vm0, %v466_v1  ;;  %v1715_v21 = vld [vmem:[%s2325_s3] ss:$0 sm:$0xff]  ;;  %p1944_p11 = scmp.ne.s32.totalorder %s2273_s15, %s1943_s21  ;;  %p1950_p0 = scmp.lt.s32.totalorder %s2273_s15, %s1948_s0 }
  0x1d   : > { %1809 = vmatmul.mubr.msk.f32.vlgmr.msra.gmra.mxu0 %vm476_vm0, %v467_v2  ;;  %v1716_v24 = vld [vmem:[%s2326_s4] ss:$0 sm:$0xff]  ;;  %v1044_v2 = vld [vmem:[%s2333_s11 + $0x28] sm:$0xff]  ;;  %p1951_p1 = scmp.lt.s32.totalorder %s1949_s1, %s1943_s21 }
  0x1e   : > { %1817 = vmatpush3.msk.msra.mxu0 %vm568_vm1, %v558_v3  ;;  %v846_v33 = vld [vmem:[%s2332_s10] sm:$0xff]  ;;  %v1045_v3 = vld [vmem:[%s2333_s11 + $0x30] sm:$0xff]  ;;  %p1945_p12 = pnand %p1944_p11, %p2121_p5 }
  0x1f   : > { %1826 = vmatprep.subr.mxu0 %v847_v32  ;;  %v1717_v35 = vld [vmem:[%s2329_s7] ss:$0 sm:$0xff]  ;;  %p1952_p2 = por %p1951_p1, %p1950_p0 }
  0x20   : > { %v1039_v45 = vld [vmem:[%s2333_s11] sm:$0xff]  ;;  %p1946_p13 = pneg %p1945_p12 }
  0x21   : > { %v1725_v51 = vld [vmem:[%s2330_s8] ss:$0 sm:$0xff] }
  0x22   : > { %v1726_v54 = vld [vmem:[%s2331_s9] ss:$0 sm:$0xff]  ;;  %p1953_p3 = pnand %p1952_p2, %p1946_p13 }
  0x23   : > { %v1043_v1 = vld [vmem:[%s2333_s11 + $0x20] sm:$0xff] }
  0xdd   : > { %v1810_v4 = vpop.f32.mrf.mxu0 }
  0xde   : > { %v555_v8 = vadd.f32 %v1810_v4, %v1706_v5  ;;  %v1046_v4 = vld [vmem:[%s2333_s11 + $0x38] sm:$0xff] }
  0xdf   : > { %v549_v6 = vpop.f32.mrf.mxu0 }
  0xe0   : > { %v550_v7 = vadd.f32 %v1706_v5, %v549_v6  ;;  %v1047_v5 = vld [vmem:[%s2333_s11 + $0x40] sm:$0xff]  ;;  %v1048_v6 = vld [vmem:[%s2333_s11 + $0x48] sm:$0xff] }
  0xe2   : > { %1813 = vmatprep.mubr.msk.f32.mxu1 %vm561_vm2, %v550_v7 }
  0xe3   : > { %1814 = vmatmul.mubr.msk.f32.vlgmr.msra.gmra.mxu1 %vm561_vm2, %v555_v8 }
  0xe4   : > { %1822 = vmatpush3.msk.msra.mxu1 %vm568_vm1, %v754_v15 }
  0xe5   : > { %1833 = vmatprep.subr.mxu1 %v847_v32 }
 0x1a3   : > { %v1815_v9 = vpop.f32.mrf.mxu1 }
 0x1a4   : > { %v648_v10 = vsub.f32 %v555_v8, %v1815_v9  ;;  %v1194_v8 = vld [vmem:[%s2334_s12] sm:$0xff]  ;;  %v1197_v9 = vld [vmem:[%s2334_s12 + $0x18] sm:$0xff] }
 0x1a5   : > { %v638_v11 = vpop.f32.mrf.mxu1 }
 0x1a6   : > { %v647_v12 = vsub.f32 %v550_v7, %v638_v11  ;;  %v650_v14 = vmul.f32 %v648_v10, %v648_v10  ;;  %v1195_v7 = vld [vmem:[%s2334_s12 + $0x8] sm:$0xff] }
 0x1a8   : > { %v649_v13 = vmul.f32 %v647_v12, %v647_v12 }
 0x1aa   : > { %1818 = vmatprep.mubr.msk.f32.mxu0 %vm561_vm2, %v649_v13 }
 0x1ab   : > { %1819 = vmatmul.mubr.msk.f32.vlgmr.msra.gmra.mxu0 %vm561_vm2, %v650_v14  ;;  %v1199_v14 = vld [vmem:[%s2334_s12 + $0x28] sm:$0xff] }
 0x1ac   : > { %1827 = vmatpush3.msra.mxu0 %v847_v32 }
 0x1ad   : > { %1828 = vmatprep.subr.mxu0 %v846_v33 }
 0x1ae   : > { %1829 = vmatpush3.msra.mxu0 %v846_v33 }
 0x26b   : > { %v1820_v16 = vpop.f32.mrf.mxu0 }
 0x26c   : > { %v729_v17 = vadd.f32 1e-05, %v1820_v16  ;;  %v1198_v16 = vld [vmem:[%s2334_s12 + $0x20] sm:$0xff] }
 0x26d   : > { %v723_v18 = vpop.f32.mrf.mxu0 }
 0x26e   : > { %1935 = vrsqrt.f32 %v729_v17  ;;  %v724_v19 = vadd.f32 1e-05, %v723_v18  ;;  %v1201_v18 = vld [vmem:[%s2334_s12 + $0x38] sm:$0xff] }
 0x270   : > { %1937 = vrsqrt.f32 %v724_v19 }
 0x27b   : > { %v1936_v20 = vpop.eup %1935 }
 0x27c   : > { %v735_v22 = vmul.f32 %v1936_v20, %v648_v10  ;;  %v1200_v20 = vld [vmem:[%s2334_s12 + $0x30] sm:$0xff] }
 0x27d   : > { %v1938_v23 = vpop.eup %1937 }
 0x27e   : > { %v734_v25 = vmul.f32 %v1938_v23, %v647_v12  ;;  %v743_v26 = vmul.f32 %v1715_v21, %v735_v22  ;;  %v1196_v12 = vld [vmem:[%s2334_s12 + $0x10] sm:$0xff]  ;;  %v1203_v22 = vld [vmem:[%s2334_s12 + $0x48] sm:$0xff] }
 0x280   : > { %v742_v27 = vmul.f32 %v1715_v21, %v734_v25  ;;  %v751_v28 = vadd.f32 %v1716_v24, %v743_v26 }
 0x282   : > { %v750_v29 = vadd.f32 %v1716_v24, %v742_v27  ;;  %v753_v31 = vmax.f32 %v751_v28, 0.0  ;;  %v1202_v24 = vld [vmem:[%s2334_s12 + $0x40] sm:$0xff] }
 0x284   : > { %v752_v30 = vmax.f32 %v750_v29, 0.0 }
 0x286   : > { %1823 = vmatprep.mubr.msk.f32.mxu1 %vm561_vm2, %v752_v30  ;;  %v1205_v30 = vld [vmem:[%s2335_s13 + $0x8] sm:$0xff] }
 0x287   : > { %1824 = vmatmul.mubr.msk.f32.vlgmr.msra.gmra.mxu1 %vm561_vm2, %v753_v31 }
 0x288   : > { %1834 = vmatpush3.msra.mxu1 %v847_v32  ;;  %v1204_v32 = vld [vmem:[%s2335_s13] sm:$0xff] }
 0x289   : > { %1835 = vmatprep.subr.mxu1 %v846_v33 }
 0x28a   : > { %1836 = vmatpush3.msra.mxu1 %v846_v33 }
 0x28b   : > { %1859 = vmatprep.subr.mxu1 %v1195_v7 }
 0x347   : > { %v1825_v34 = vpop.f32.mrf.mxu1 }
 0x348   : > { %v843_v38 = vadd.f32 %v1825_v34, %v1717_v35 }
 0x349   : > { %v837_v36 = vpop.f32.mrf.mxu1 }
 0x34a   : > { %v838_v37 = vadd.f32 %v1717_v35, %v837_v36 }
 0x34c   : > { %1830 = vmatprep.mubr.msk.f32.mxu0 %vm850_vm3, %v838_v37 }
 0x34d   : > { %1831 = vmatmul.mubr.msk.f32.vlgmr.msra.gmra.mxu0 %vm850_vm3, %v843_v38 }
 0x34e   : > { %1844 = vmatprep.mubr.msk.f32.mxu0 %vm850_vm3, %v1039_v45 }
 0x40d   : > { %v1832_v39 = vpop.f32.mrf.mxu0 }
 0x40e   : > { %v933_v40 = vsub.f32 %v843_v38, %v1832_v39 }
 0x40f   : > { %v923_v41 = vpop.f32.mrf.mxu0 }
 0x410   : > { %v932_v42 = vsub.f32 %v838_v37, %v923_v41  ;;  %v935_v44 = vmul.f32 %v933_v40, %v933_v40 }
 0x412   : > { %v934_v43 = vmul.f32 %v932_v42, %v932_v42 }
 0x414   : > { %1837 = vmatprep.mubr.msk.f32.mxu1 %vm850_vm3, %v934_v43 }
 0x415   : > { %1838 = vmatmul.mubr.msk.f32.vlgmr.msra.gmra.mxu1 %vm850_vm3, %v935_v44 }
 0x416   : > { %1860 = vmatpush3.msra.mxu1 %v1195_v7 }
 0x417   : > { %1861 = vmatprep.subr.mxu1 %v1194_v8 }
 0x418   : > { %1862 = vmatpush3.msra.mxu1 %v1194_v8 }
 0x419   : > { %1866 = vmatprep.subr.mxu1 %v1197_v9 }
 0x4d5   : > { %v1839_v46 = vpop.f32.mrf.mxu1 }
 0x4d6   : > { %v1014_v47 = vadd.f32 1e-05, %v1839_v46 }
 0x4d7   : > { %v1008_v48 = vpop.f32.mrf.mxu1 }
 0x4d8   : > { %1939 = vrsqrt.f32 %v1014_v47  ;;  %v1009_v49 = vadd.f32 1e-05, %v1008_v48 }
 0x4da   : > { %1941 = vrsqrt.f32 %v1009_v49 }
 0x4e5   : > { %v1940_v50 = vpop.eup %1939 }
 0x4e6   : > { %v1020_v52 = vmul.f32 %v1940_v50, %v933_v40 }
 0x4e7   : > { %v1942_v53 = vpop.eup %1941 }
 0x4e8   : > { %v1028_v55 = vmul.f32 %v1725_v51, %v1020_v52  ;;  %v1019_v56 = vmul.f32 %v1942_v53, %v932_v42 }
 0x4ea   : > { %v1036_v57 = vadd.f32 %v1726_v54, %v1028_v55  ;;  %v1027_v58 = vmul.f32 %v1725_v51, %v1019_v56 }
 0x4ec   : > { %v1038_v59 = vmax.f32 %v1036_v57, 0.0  ;;  %v1035_v60 = vadd.f32 %v1726_v54, %v1027_v58 }
 0x4ee   : > { %1840 = vmatprep.subr.mxu0 %v1038_v59  ;;  %v1037_v61 = vmax.f32 %v1035_v60, 0.0 }
 0x4ef   : > { %1841 = vmatpush3.msra.mxu0 %v1038_v59 }
 0x4f0   : > { %1842 = vmatprep.subr.mxu0 %v1037_v61 }
 0x4f1   : > { %1843 = vmatpush3.msra.mxu0 %v1037_v61 }
 0x4f2   : > { %1845 = vmatmul.mubr.msk.f32.vlgmr.msra.gmra.mxu0 %vm850_vm3, %v1040_v62 }
 0x4f3   : > { %1847 = vmatprep.mubr.msk.f32.mxu0 %vm850_vm3, %v1041_v63 }
 0x4f6   : > { %1848 = vmatmul.mubr.msk.f32.gmra.mxu0 %vm850_vm3, %v1042_v0 }
 0x4f7   : > { %1850 = vmatprep.mubr.msk.f32.mxu0 %vm850_vm3, %v1043_v1 }
 0x4fa   : > { %1851 = vmatmul.mubr.msk.f32.gmra.mxu0 %vm850_vm3, %v1044_v2 }
 0x4fb   : > { %1853 = vmatprep.mubr.msk.f32.mxu0 %vm850_vm3, %v1045_v3 }
 0x4fe   : > { %1854 = vmatmul.mubr.msk.f32.gmra.mxu0 %vm850_vm3, %v1046_v4 }
 0x4ff   : > { %1856 = vmatprep.mubr.msk.f32.mxu0 %vm850_vm3, %v1047_v5 }
 0x502   : > { %1857 = vmatmul.mubr.msk.f32.gmra.mxu0 %vm850_vm3, %v1048_v6 }
 0x5b2   : > { %v1846_v10 = vpop.f32.mrf.mxu0 }
 0x5b4   : > { %v1145_v11 = vpop.f32.mrf.mxu0 }
 0x5b5   : > { %1863 = vmatprep.mubr.msk.f32.mxu1 %vm850_vm3, %v1145_v11 }
 0x5b6   : > { %v1849_v13 = vpop.f32.mrf.mxu0  ;;  %1864 = vmatmul.mubr.msk.f32.vlgmr.msra.gmra.mxu1 %vm850_vm3, %v1846_v10 }
 0x5b7   : > { %1867 = vmatpush3.msra.mxu1 %v1197_v9 }
 0x5b8   : > { %v1155_v15 = vpop.f32.mrf.mxu0  ;;  %1868 = vmatprep.subr.mxu1 %v1196_v12 }
 0x5b9   : > { %1869 = vmatpush3.msra.mxu1 %v1196_v12  ;;  %1870 = vmatprep.mubr.msk.f32.mxu1 %vm850_vm3, %v1155_v15 }
 0x5ba   : > { %v1852_v17 = vpop.f32.mrf.mxu0  ;;  %1871 = vmatmul.mubr.msk.f32.vlgmr.msra.gmra.mxu1 %vm850_vm3, %v1849_v13  ;;  %1873 = vmatprep.subr.mxu1 %v1199_v14 }
 0x5bb   : > { %1874 = vmatpush3.msra.mxu1 %v1199_v14 }
 0x5bc   : > { %v1165_v19 = vpop.f32.mrf.mxu0  ;;  %1875 = vmatprep.subr.mxu1 %v1198_v16 }
 0x5bd   : > { %1876 = vmatpush3.msra.mxu1 %v1198_v16  ;;  %1877 = vmatprep.mubr.msk.f32.mxu1 %vm850_vm3, %v1165_v19 }
 0x5be   : > { %v1855_v21 = vpop.f32.mrf.mxu0  ;;  %1878 = vmatmul.mubr.msk.f32.vlgmr.msra.gmra.mxu1 %vm850_vm3, %v1852_v17  ;;  %1880 = vmatprep.subr.mxu1 %v1201_v18 }
 0x5bf   : > { %1881 = vmatpush3.msra.mxu1 %v1201_v18 }
 0x5c0   : > { %v1175_v23 = vpop.f32.mrf.mxu0  ;;  %1882 = vmatprep.subr.mxu1 %v1200_v20 }
 0x5c1   : > { %1883 = vmatpush3.msra.mxu1 %v1200_v20  ;;  %1884 = vmatprep.mubr.msk.f32.mxu1 %vm850_vm3, %v1175_v23 }
 0x5c2   : > { %v1858_v25 = vpop.f32.mrf.mxu0  ;;  %1885 = vmatmul.mubr.msk.f32.vlgmr.msra.gmra.mxu1 %vm850_vm3, %v1855_v21  ;;  %1887 = vmatprep.subr.mxu1 %v1203_v22 }
 0x5c3   : > { %1888 = vmatpush3.msra.mxu1 %v1203_v22 }
 0x5c4   : > { %v1185_v26 = vpop.f32.mrf.mxu0  ;;  %1889 = vmatprep.subr.mxu1 %v1202_v24 }
 0x5c5   : > { %1890 = vmatpush3.msra.mxu1 %v1202_v24  ;;  %1891 = vmatprep.mubr.msk.f32.mxu1 %vm850_vm3, %v1185_v26 }
 0x5c6   : > { %1892 = vmatmul.mubr.msk.f32.vlgmr.msra.gmra.mxu1 %vm850_vm3, %v1858_v25 }
 0x676   : > { %v1865_v27 = vpop.f32.mrf.mxu1 }
 0x677   : > { %v1288_v34 = vadd.f32 %v1865_v27, %v1205_v30 }
 0x678   : > { %v1278_v28 = vpop.f32.mrf.mxu1 }
 0x679   : > { %v1287_v36 = vadd.f32 %v1278_v28, %v1204_v32 }
 0x67a   : > { %v1872_v29 = vpop.f32.mrf.mxu1 }
 0x67b   : > { %v1371_v37 = vadd.f32 %v1872_v29, %v1288_v34 }
 0x67c   : > { %v1361_v31 = vpop.f32.mrf.mxu1 }
 0x67d   : > { %v1370_v39 = vadd.f32 %v1361_v31, %v1287_v36 }
 0x67e   : > { %v1879_v33 = vpop.f32.mrf.mxu1 }
 0x67f   : > { %v1454_v40 = vadd.f32 %v1879_v33, %v1371_v37 }
 0x680   : > { %v1444_v35 = vpop.f32.mrf.mxu1 }
 0x681   : > { %v1453_v42 = vadd.f32 %v1444_v35, %v1370_v39 }
 0x682   : > { %v1886_v38 = vpop.f32.mrf.mxu1 }
 0x683   : > { %v1537_v43 = vadd.f32 %v1886_v38, %v1454_v40 }
 0x684   : > { %v1527_v41 = vpop.f32.mrf.mxu1 }
 0x685   : > { %v1536_v45 = vadd.f32 %v1527_v41, %v1453_v42 }
 0x686   : > { %v1893_v44 = vpop.f32.mrf.mxu1 }
 0x687   : > { %v1620_v46 = vadd.f32 %v1893_v44, %v1537_v43 }
 0x688   : > { %v1610_v47 = vpop.f32.mrf.mxu1 }
 0x689   : > { %1622 = vst.msk [vmem:[%s460_s26 + $0x8] sm:$0xff] %vm850_vm3, %v1620_v46  ;;  %v1619_v48 = vadd.f32 %v1610_v47, %v1536_v45 }
 0x68b   : > { %1621 = vst.msk [vmem:[%s460_s26] sm:$0xff] %vm850_vm3, %v1619_v48 }
 0x68c   : > { %1956 = shalt.err (!%p1953_p3)
}
 0x68d   : > { %s1957_s18 = scalar_lea.hbm %s2278_s20, 256  ;;  %s1961_s27 = scalar_lea.hbm %s2336_s14, 512 }
 0x68e   : > { %p1958_p4 = scmp.ne.s32.totalorder %s2278_s20, %s1957_s18  ;;  %p1962_p9 = scmp.lt.s32.totalorder %s2278_s20, %s2336_s14 }
 0x68f   : > { %p1963_p10 = scmp.lt.s32.totalorder %s1961_s27, %s1957_s18 }
 0x690   : > { %p1959_p7 = pnand %p1958_p4, %p2121_p5 }
 0x691   : > { %p1964_p11 = por %p1963_p10, %p1962_p9 }
 0x692   : > { %p1960_p8 = pneg %p1959_p7 }
 0x694   : > { %p1965_p12 = pnand %p1964_p11, %p1960_p8 }
 0x696   : > { %1968 = shalt.err (!%p1965_p12)
}
 0x697   : > { %s2006_s0 = smov 128   ;;  %s2007_s1 = smov 8  }
 0x698   : > { %1894 = dma.vmem_to_hbm [thread:$0]  (%p2121_p5), %s2273_s15, 256, %s2278_s20, %s2282_s17, %s2006_s0, %s2006_s0, %s2007_s1  }
 0x699 PF: > { %p1900_p13 = scmp.ge.s32.totalorder %s2003_s16, 2  ;;  %s1652_s21 = sand.u32 1, %s1991_s29  }
 0x69a   : > { %s1653_s18 = scalar_lea.sflag [#allocation3], %s1652_s21 }
 0x69b   : > { %p1897_p0 = pnand %p1900_p13, %p2125_p6 }
 0x69d   : > { %p1898_p1 = pneg %p1897_p0 }
 0x69f   : > { %1986 = dma.done.wait (%p1898_p1), %s1653_s18, 256  }
 0x6a0   : > { %1988 = vsyncadd (%p1898_p1), %s1653_s18, 4294967040  ;;  %s2346_s26 = sld [smem:[#allocation5_spill]]  ;;  %p24_p2 = scmp.ge.s32.totalorder %s2108_s19, 4  }
 0x6a1   : > { %s2347_s15 = sld [smem:[#allocation6_spill]]  ;;  %s2348_s29 = smov %s1995_s30 }
 0x6a2   : > { %s2350_s16 = smov %s2108_s19  ;;  %26 = sbr.rel (!%p24_p2) target bundleno = 6 (0x6), region = 111 }
 0x6a6   : > { %s2349_s30 = smov %s2346_s26 }
 0x6a7   :  { %1658 = vsyncpa [#allocation3], 1 }
 0x6a8   :  { %1660 = vsyncpa [#allocation3 + $0x1], 1 }

// kernel: tpu_custom_call.1
= control target key start
LH: loop header
LB: loop body
LE: loop exit
PB: predicated region body
PF: predicated region fallthrough
CT: control target
= control target key end

     0   :  { %s2322_s0 = inlined_call_operand.vmem [shape: f32[2,16,8], index: 0, kind: input, shape index: {}]   ;;  %s2323_s1 = inlined_call_operand.vmem [shape: f32[8,4], index: 1, kind: input, shape index: {}]   ;;  %s2324_s2 = inlined_call_operand.vmem [shape: f32[1,4], index: 2, kind: input, shape index: {}]   ;;  %s2325_s3 = inlined_call_operand.vmem [shape: f32[1,4], index: 3, kind: input, shape index: {}]   ;;  %s2326_s4 = inlined_call_operand.vmem [shape: f32[1,4], index: 4, kind: input, shape index: {}]   ;;  %s2327_s5 = inlined_call_operand.vmem [shape: f32[4,4], index: 5, kind: input, shape index: {}]   ;;  %s2328_s6 = inlined_call_operand.vmem [shape: f32[4,16], index: 6, kind: input, shape index: {}]   ;;  %s2329_s7 = inlined_call_operand.vmem [shape: f32[1,16], index: 7, kind: input, shape index: {}]   ;;  %s2330_s8 = inlined_call_operand.vmem [shape: f32[1,16], index: 8, kind: input, shape index: {}]   ;;  %s2331_s9 = inlined_call_operand.vmem [shape: f32[1,16], index: 9, kind: input, shape index: {}]   ;;  %s2332_s10 = inlined_call_operand.vmem [shape: f32[16,16], index: 10, kind: input, shape index: {}]   ;;  %s2333_s11 = inlined_call_operand.vmem [shape: f32[80,16], index: 11, kind: input, shape index: {}]   ;;  %s2334_s12 = inlined_call_operand.vmem [shape: f32[5,16,16], index: 12, kind: input, shape index: {}]   ;;  %s2335_s13 = inlined_call_operand.vmem [shape: f32[16,16], index: 13, kind: input, shape index: {}]   ;;  %s2336_s14 = inlined_call_operand.hbm [shape: f32[2,16,16], index: 14, kind: output, shape index: {}]  }
   0x1   :  { %2338 = sst [smem:[#allocation7_spill]] %s2322_s0 }
   0x2   :  { %2339 = sst [smem:[#allocation8_spill]] %s2323_s1 }
   0x3   :  { %19 = vsyncpa [#allocation3], 0 }
   0x4   :  { %21 = vsyncpa [#allocation3 + $0x1], 0  ;;  %s2083_s29 = smov 0   ;;  %s2085_s30 = smov 0  }
   0x5   :  { %s2087_s15 = smov 0   ;;  %s2089_s16 = smov 0  }
   0x6 LB: > { %2340 = sst [smem:[#allocation5_spill]] %s1999_s15  ;;  %s2104_s17 = sadd.s32 4294967295, %s2003_s16   ;;  %s2003_s16 = sphi %s2089_s16, %s2350_s16   ;;  %s1999_s15 = sphi %s2087_s15, %s2347_s15   ;;  %s1995_s30 = sphi %s2085_s30, %s2349_s30   ;;  %s1991_s29 = sphi %s2083_s29, %s2348_s29  }
   0x7   : > { %s1699_s18 = sadd.s32 4294967294, %s2003_s16   ;;  %s2108_s19 = sadd.s32 1, %s2003_s16  }
   0x8   : > { %s333_s20 = sadd.s32 1, %s1999_s15  ;;  %s330_s21 = ssub.s32 %s2003_s16, %s2108_s19 }
   0x9   : > { %p343_p0 = scmp.ne.s32.totalorder %s1999_s15, %s1995_s30  ;;  %p331_p1 = scmp.eq.s32.totalorder %s330_s21, 0 }
   0xa   : > { %p344_p2 = scmp.eq.s32.totalorder %s2104_s17, 1  ;;  %p349_p3 = scmp.ne.s32.totalorder %s1995_s30, %s1991_s29 }
   0xb   : > { %p350_p4 = scmp.eq.s32.totalorder %s1699_s18, 1  ;;  %p1702_p7 = scmp.ge.s32.totalorder %s2003_s16, 1 }
   0xc   : > { %s2119_s22 = scalar_select %p331_p1, %s1999_s15, %s333_s20  }
   0xd   : > { %p2121_p5 = por %p344_p2, %p343_p0  ;;  %p2125_p6 = por %p350_p4, %p349_p3 }
   0xe   : > { %2341 = sst [smem:[#allocation6_spill]] %s2119_s22  ;;  %p415_p8 = scmp.lt.s32.totalorder %s2003_s16, 3 }
  0x10   : > { %p416_p9 = pnand %p1702_p7, %p415_p8 }
  0x11   : > { %s2344_s1 = sld [smem:[#allocation8_spill]] (!%p416_p9)  ;;  %p461_p10 = scmp.lt.s32.totalorder (!%p416_p9), %s2104_s17, 1 }
  0x12   : > { %419 = sbr.rel (%p416_p9) target bundleno = 1689 (0x699), region = 76  ;;  %s2345_s0 = sld [smem:[#allocation7_spill]] (!%p416_p9) }
  0x13   : > { %s458_s18 = sand.u32 (!%p416_p9), 1, %s1995_s30   ;;  %s1753_s22 = sshll.u32 (!%p416_p9), %s2104_s17, 8 }
  0x14   : > { %s1703_s25 = sshll.u32 (!%p416_p9), %s458_s18, 4  ;;  %s2278_s20 = scalar_lea.hbm (!%p416_p9), %s2336_s14, %s1753_s22 }
  0x15   : > { %s460_s26 = scalar_lea.vmem (!%p416_p9), [#allocation2], %s1703_s25  ;;  %s2005_s25 = smov (!%p416_p9), [#allocation2]  }
  0x16   : > { %s1637_s15 = sshll.u32 (!%p416_p9), %s460_s26, 4  ;;  %s2273_s15 = int_to_ptr.vmem [resolvable:$true] %s1637_s15 }
  0x17   : > { %v468_v0 = vld [vmem:[%s2344_s1] sm:$0xff]  ;;  %s462_s27 = scalar_select %p461_p10, %s2104_s17, 1  ;;  %vm476_vm0 = vcmask 64512   ;;  %vm568_vm1 = vcmask 1043456   ;;  %vm561_vm2 = vcmask 31744   ;;  %v847_v32 = vld [vmem:[%s2332_s10 + $0x8] sm:$0xff] }
  0x18   : > { %1806 = vmatprep.subr.mxu0 %v468_v0  ;;  %v558_v3 = vld [vmem:[%s2327_s5] sm:$0xf]  ;;  %vm850_vm3 = vcmask 130048   ;;  %v1040_v62 = vld [vmem:[%s2333_s11 + $0x8] sm:$0xff]  ;;  %v1041_v63 = vld [vmem:[%s2333_s11 + $0x10] sm:$0xff]  ;;  %s2282_s17 = scalar_lea.sflag [#allocation3], %s458_s18 }
  0x19   : > { %1807 = vmatpush3.msra.mxu0 %v468_v0  ;;  %s1752_s28 = sshll.u32 %s462_s27, 4  ;;  %1811 = vmatprep.subr.msk.mxu1 %vm568_vm1, %v558_v3  ;;  %v1706_v5 = vld [vmem:[%s2324_s2] ss:$0 sm:$0xff]  ;;  %v1042_v0 = vld [vmem:[%s2333_s11 + $0x18] sm:$0xff] }
  0x1a   : > { %s465_s21 = scalar_lea.vmem %s2345_s0, %s1752_s28  ;;  %1816 = vmatprep.subr.msk.mxu0 %vm568_vm1, %v558_v3  ;;  %1812 = vmatpush3.msk.msra.mxu1 %vm568_vm1, %v558_v3  ;;  %v754_v15 = vld [vmem:[%s2328_s6] sm:$0xf]  ;;  %s1947_s0 = sshll.u32 %s2005_s25, 4  ;;  %s1948_s0 = int_to_ptr.vmem [resolvable:$false] %s1947_s0 }
  0x1b   : > { %v466_v1 = vld [vmem:[%s465_s21] sm:$0xff]  ;;  %v467_v2 = vld [vmem:[%s465_s21 + $0x8] sm:$0xff]  ;;  %1821 = vmatprep.subr.msk.mxu1 %vm568_vm1, %v754_v15  ;;  %s1943_s21 = scalar_lea.vmem %s2273_s15, 256  ;;  %s1949_s1 = scalar_lea.vmem %s1948_s0, 512 }
  0x1c   : > { %1808 = vmatprep.mubr.msk.f32.mxu0 %vm476_vm0, %v466_v1  ;;  %v1715_v21 = vld [vmem:[%s2325_s3] ss:$0 sm:$0xff]  ;;  %p1944_p11 = scmp.ne.s32.totalorder %s2273_s15, %s1943_s21  ;;  %p1950_p0 = scmp.lt.s32.totalorder %s2273_s15, %s1948_s0 }
  0x1d   : > { %1809 = vmatmul.mubr.msk.f32.vlgmr.msra.gmra.mxu0 %vm476_vm0, %v467_v2  ;;  %v1716_v24 = vld [vmem:[%s2326_s4] ss:$0 sm:$0xff]  ;;  %v1044_v2 = vld [vmem:[%s2333_s11 + $0x28] sm:$0xff]  ;;  %p1951_p1 = scmp.lt.s32.totalorder %s1949_s1, %s1943_s21 }
  0x1e   : > { %1817 = vmatpush3.msk.msra.mxu0 %vm568_vm1, %v558_v3  ;;  %v846_v33 = vld [vmem:[%s2332_s10] sm:$0xff]  ;;  %v1045_v3 = vld [vmem:[%s2333_s11 + $0x30] sm:$0xff]  ;;  %p1945_p12 = pnand %p1944_p11, %p2121_p5 }
  0x1f   : > { %1826 = vmatprep.subr.mxu0 %v847_v32  ;;  %v1717_v35 = vld [vmem:[%s2329_s7] ss:$0 sm:$0xff]  ;;  %p1952_p2 = por %p1951_p1, %p1950_p0 }
  0x20   : > { %v1039_v45 = vld [vmem:[%s2333_s11] sm:$0xff]  ;;  %p1946_p13 = pneg %p1945_p12 }
  0x21   : > { %v1725_v51 = vld [vmem:[%s2330_s8] ss:$0 sm:$0xff] }
  0x22   : > { %v1726_v54 = vld [vmem:[%s2331_s9] ss:$0 sm:$0xff]  ;;  %p1953_p3 = pnand %p1952_p2, %p1946_p13 }
  0x23   : > { %v1043_v1 = vld [vmem:[%s2333_s11 + $0x20] sm:$0xff] }
  0xdd   : > { %v1810_v4 = vpop.f32.mrf.mxu0 }
  0xde   : > { %v555_v8 = vadd.f32 %v1810_v4, %v1706_v5  ;;  %v1046_v4 = vld [vmem:[%s2333_s11 + $0x38] sm:$0xff] }
  0xdf   : > { %v549_v6 = vpop.f32.mrf.mxu0 }
  0xe0   : > { %v550_v7 = vadd.f32 %v1706_v5, %v549_v6  ;;  %v1047_v5 = vld [vmem:[%s2333_s11 + $0x40] sm:$0xff]  ;;  %v1048_v6 = vld [vmem:[%s2333_s11 + $0x48] sm:$0xff] }
  0xe2   : > { %1813 = vmatprep.mubr.msk.f32.mxu1 %vm561_vm2, %v550_v7 }
  0xe3   : > { %1814 = vmatmul.mubr.msk.f32.vlgmr.msra.gmra.mxu1 %vm561_vm2, %v555_v8 }
  0xe4   : > { %1822 = vmatpush3.msk.msra.mxu1 %vm568_vm1, %v754_v15 }
  0xe5   : > { %1833 = vmatprep.subr.mxu1 %v847_v32 }
 0x1a3   : > { %v1815_v9 = vpop.f32.mrf.mxu1 }
 0x1a4   : > { %v648_v10 = vsub.f32 %v555_v8, %v1815_v9  ;;  %v1194_v8 = vld [vmem:[%s2334_s12] sm:$0xff]  ;;  %v1197_v9 = vld [vmem:[%s2334_s12 + $0x18] sm:$0xff] }
 0x1a5   : > { %v638_v11 = vpop.f32.mrf.mxu1 }
 0x1a6   : > { %v647_v12 = vsub.f32 %v550_v7, %v638_v11  ;;  %v650_v14 = vmul.f32 %v648_v10, %v648_v10  ;;  %v1195_v7 = vld [vmem:[%s2334_s12 + $0x8] sm:$0xff] }
 0x1a8   : > { %v649_v13 = vmul.f32 %v647_v12, %v647_v12 }
 0x1aa   : > { %1818 = vmatprep.mubr.msk.f32.mxu0 %vm561_vm2, %v649_v13 }
 0x1ab   : > { %1819 = vmatmul.mubr.msk.f32.vlgmr.msra.gmra.mxu0 %vm561_vm2, %v650_v14  ;;  %v1199_v14 = vld [vmem:[%s2334_s12 + $0x28] sm:$0xff] }
 0x1ac   : > { %1827 = vmatpush3.msra.mxu0 %v847_v32 }
 0x1ad   : > { %1828 = vmatprep.subr.mxu0 %v846_v33 }
 0x1ae   : > { %1829 = vmatpush3.msra.mxu0 %v846_v33 }
 0x26b   : > { %v1820_v16 = vpop.f32.mrf.mxu0 }
 0x26c   : > { %v729_v17 = vadd.f32 1e-05, %v1820_v16  ;;  %v1198_v16 = vld [vmem:[%s2334_s12 + $0x20] sm:$0xff] }
 0x26d   : > { %v723_v18 = vpop.f32.mrf.mxu0 }
 0x26e   : > { %1935 = vrsqrt.f32 %v729_v17  ;;  %v724_v19 = vadd.f32 1e-05, %v723_v18  ;;  %v1201_v18 = vld [vmem:[%s2334_s12 + $0x38] sm:$0xff] }
 0x270   : > { %1937 = vrsqrt.f32 %v724_v19 }
 0x27b   : > { %v1936_v20 = vpop.eup %1935 }
 0x27c   : > { %v735_v22 = vmul.f32 %v1936_v20, %v648_v10  ;;  %v1200_v20 = vld [vmem:[%s2334_s12 + $0x30] sm:$0xff] }
 0x27d   : > { %v1938_v23 = vpop.eup %1937 }
 0x27e   : > { %v734_v25 = vmul.f32 %v1938_v23, %v647_v12  ;;  %v743_v26 = vmul.f32 %v1715_v21, %v735_v22  ;;  %v1196_v12 = vld [vmem:[%s2334_s12 + $0x10] sm:$0xff]  ;;  %v1203_v22 = vld [vmem:[%s2334_s12 + $0x48] sm:$0xff] }
 0x280   : > { %v742_v27 = vmul.f32 %v1715_v21, %v734_v25  ;;  %v751_v28 = vadd.f32 %v1716_v24, %v743_v26 }
 0x282   : > { %v750_v29 = vadd.f32 %v1716_v24, %v742_v27  ;;  %v753_v31 = vmax.f32 %v751_v28, 0.0  ;;  %v1202_v24 = vld [vmem:[%s2334_s12 + $0x40] sm:$0xff] }
 0x284   : > { %v752_v30 = vmax.f32 %v750_v29, 0.0 }
 0x286   : > { %1823 = vmatprep.mubr.msk.f32.mxu1 %vm561_vm2, %v752_v30  ;;  %v1205_v30 = vld [vmem:[%s2335_s13 + $0x8] sm:$0xff] }
 0x287   : > { %1824 = vmatmul.mubr.msk.f32.vlgmr.msra.gmra.mxu1 %vm561_vm2, %v753_v31 }
 0x288   : > { %1834 = vmatpush3.msra.mxu1 %v847_v32  ;;  %v1204_v32 = vld [vmem:[%s2335_s13] sm:$0xff] }
 0x289   : > { %1835 = vmatprep.subr.mxu1 %v846_v33 }
 0x28a   : > { %1836 = vmatpush3.msra.mxu1 %v846_v33 }
 0x28b   : > { %1859 = vmatprep.subr.mxu1 %v1195_v7 }
 0x347   : > { %v1825_v34 = vpop.f32.mrf.mxu1 }
 0x348   : > { %v843_v38 = vadd.f32 %v1825_v34, %v1717_v35 }
 0x349   : > { %v837_v36 = vpop.f32.mrf.mxu1 }
 0x34a   : > { %v838_v37 = vadd.f32 %v1717_v35, %v837_v36 }
 0x34c   : > { %1830 = vmatprep.mubr.msk.f32.mxu0 %vm850_vm3, %v838_v37 }
 0x34d   : > { %1831 = vmatmul.mubr.msk.f32.vlgmr.msra.gmra.mxu0 %vm850_vm3, %v843_v38 }
 0x34e   : > { %1844 = vmatprep.mubr.msk.f32.mxu0 %vm850_vm3, %v1039_v45 }
 0x40d   : > { %v1832_v39 = vpop.f32.mrf.mxu0 }
 0x40e   : > { %v933_v40 = vsub.f32 %v843_v38, %v1832_v39 }
 0x40f   : > { %v923_v41 = vpop.f32.mrf.mxu0 }
 0x410   : > { %v932_v42 = vsub.f32 %v838_v37, %v923_v41  ;;  %v935_v44 = vmul.f32 %v933_v40, %v933_v40 }
 0x412   : > { %v934_v43 = vmul.f32 %v932_v42, %v932_v42 }
 0x414   : > { %1837 = vmatprep.mubr.msk.f32.mxu1 %vm850_vm3, %v934_v43 }
 0x415   : > { %1838 = vmatmul.mubr.msk.f32.vlgmr.msra.gmra.mxu1 %vm850_vm3, %v935_v44 }
 0x416   : > { %1860 = vmatpush3.msra.mxu1 %v1195_v7 }
 0x417   : > { %1861 = vmatprep.subr.mxu1 %v1194_v8 }
 0x418   : > { %1862 = vmatpush3.msra.mxu1 %v1194_v8 }
 0x419   : > { %1866 = vmatprep.subr.mxu1 %v1197_v9 }
 0x4d5   : > { %v1839_v46 = vpop.f32.mrf.mxu1 }
 0x4d6   : > { %v1014_v47 = vadd.f32 1e-05, %v1839_v46 }
 0x4d7   : > { %v1008_v48 = vpop.f32.mrf.mxu1 }
 0x4d8   : > { %1939 = vrsqrt.f32 %v1014_v47  ;;  %v1009_v49 = vadd.f32 1e-05, %v1008_v48 }
 0x4da   : > { %1941 = vrsqrt.f32 %v1009_v49 }
 0x4e5   : > { %v1940_v50 = vpop.eup %1939 }
 0x4e6   : > { %v1020_v52 = vmul.f32 %v1940_v50, %v933_v40 }
 0x4e7   : > { %v1942_v53 = vpop.eup %1941 }
 0x4e8   : > { %v1028_v55 = vmul.f32 %v1725_v51, %v1020_v52  ;;  %v1019_v56 = vmul.f32 %v1942_v53, %v932_v42 }
 0x4ea   : > { %v1036_v57 = vadd.f32 %v1726_v54, %v1028_v55  ;;  %v1027_v58 = vmul.f32 %v1725_v51, %v1019_v56 }
 0x4ec   : > { %v1038_v59 = vmax.f32 %v1036_v57, 0.0  ;;  %v1035_v60 = vadd.f32 %v1726_v54, %v1027_v58 }
 0x4ee   : > { %1840 = vmatprep.subr.mxu0 %v1038_v59  ;;  %v1037_v61 = vmax.f32 %v1035_v60, 0.0 }
 0x4ef   : > { %1841 = vmatpush3.msra.mxu0 %v1038_v59 }
 0x4f0   : > { %1842 = vmatprep.subr.mxu0 %v1037_v61 }
 0x4f1   : > { %1843 = vmatpush3.msra.mxu0 %v1037_v61 }
 0x4f2   : > { %1845 = vmatmul.mubr.msk.f32.vlgmr.msra.gmra.mxu0 %vm850_vm3, %v1040_v62 }
 0x4f3   : > { %1847 = vmatprep.mubr.msk.f32.mxu0 %vm850_vm3, %v1041_v63 }
 0x4f6   : > { %1848 = vmatmul.mubr.msk.f32.gmra.mxu0 %vm850_vm3, %v1042_v0 }
 0x4f7   : > { %1850 = vmatprep.mubr.msk.f32.mxu0 %vm850_vm3, %v1043_v1 }
 0x4fa   : > { %1851 = vmatmul.mubr.msk.f32.gmra.mxu0 %vm850_vm3, %v1044_v2 }
 0x4fb   : > { %1853 = vmatprep.mubr.msk.f32.mxu0 %vm850_vm3, %v1045_v3 }
 0x4fe   : > { %1854 = vmatmul.mubr.msk.f32.gmra.mxu0 %vm850_vm3, %v1046_v4 }
 0x4ff   : > { %1856 = vmatprep.mubr.msk.f32.mxu0 %vm850_vm3, %v1047_v5 }
 0x502   : > { %1857 = vmatmul.mubr.msk.f32.gmra.mxu0 %vm850_vm3, %v1048_v6 }
 0x5b2   : > { %v1846_v10 = vpop.f32.mrf.mxu0 }
 0x5b4   : > { %v1145_v11 = vpop.f32.mrf.mxu0 }
 0x5b5   : > { %1863 = vmatprep.mubr.msk.f32.mxu1 %vm850_vm3, %v1145_v11 }
 0x5b6   : > { %v1849_v13 = vpop.f32.mrf.mxu0  ;;  %1864 = vmatmul.mubr.msk.f32.vlgmr.msra.gmra.mxu1 %vm850_vm3, %v1846_v10 }
 0x5b7   : > { %1867 = vmatpush3.msra.mxu1 %v1197_v9 }
 0x5b8   : > { %v1155_v15 = vpop.f32.mrf.mxu0  ;;  %1868 = vmatprep.subr.mxu1 %v1196_v12 }
 0x5b9   : > { %1869 = vmatpush3.msra.mxu1 %v1196_v12  ;;  %1870 = vmatprep.mubr.msk.f32.mxu1 %vm850_vm3, %v1155_v15 }
 0x5ba   : > { %v1852_v17 = vpop.f32.mrf.mxu0  ;;  %1871 = vmatmul.mubr.msk.f32.vlgmr.msra.gmra.mxu1 %vm850_vm3, %v1849_v13  ;;  %1873 = vmatprep.subr.mxu1 %v1199_v14 }
 0x5bb   : > { %1874 = vmatpush3.msra.mxu1 %v1199_v14 }
 0x5bc   : > { %v1165_v19 = vpop.f32.mrf.mxu0  ;;  %1875 = vmatprep.subr.mxu1 %v1198_v16 }
 0x5bd   : > { %1876 = vmatpush3.msra.mxu1 %v1198_v16  ;;  %1877 = vmatprep.mubr.msk.f32.mxu1 %vm850_vm3, %v1165_v19 }
 0x5be   : > { %v1855_v21 = vpop.f32.mrf.mxu0  ;;  %1878 = vmatmul.mubr.msk.f32.vlgmr.msra.gmra.mxu1 %vm850_vm3, %v1852_v17  ;;  %1880 = vmatprep.subr.mxu1 %v1201_v18 }
 0x5bf   : > { %1881 = vmatpush3.msra.mxu1 %v1201_v18 }
 0x5c0   : > { %v1175_v23 = vpop.f32.mrf.mxu0  ;;  %1882 = vmatprep.subr.mxu1 %v1200_v20 }
 0x5c1   : > { %1883 = vmatpush3.msra.mxu1 %v1200_v20  ;;  %1884 = vmatprep.mubr.msk.f32.mxu1 %vm850_vm3, %v1175_v23 }
 0x5c2   : > { %v1858_v25 = vpop.f32.mrf.mxu0  ;;  %1885 = vmatmul.mubr.msk.f32.vlgmr.msra.gmra.mxu1 %vm850_vm3, %v1855_v21  ;;  %1887 = vmatprep.subr.mxu1 %v1203_v22 }
 0x5c3   : > { %1888 = vmatpush3.msra.mxu1 %v1203_v22 }
 0x5c4   : > { %v1185_v26 = vpop.f32.mrf.mxu0  ;;  %1889 = vmatprep.subr.mxu1 %v1202_v24 }
 0x5c5   : > { %1890 = vmatpush3.msra.mxu1 %v1202_v24  ;;  %1891 = vmatprep.mubr.msk.f32.mxu1 %vm850_vm3, %v1185_v26 }
 0x5c6   : > { %1892 = vmatmul.mubr.msk.f32.vlgmr.msra.gmra.mxu1 %vm850_vm3, %v1858_v25 }
 0x676   : > { %v1865_v27 = vpop.f32.mrf.mxu1 }
 0x677   : > { %v1288_v34 = vadd.f32 %v1865_v27, %v1205_v30 }
 0x678   : > { %v1278_v28 = vpop.f32.mrf.mxu1 }
 0x679   : > { %v1287_v36 = vadd.f32 %v1278_v28, %v1204_v32 }
 0x67a   : > { %v1872_v29 = vpop.f32.mrf.mxu1 }
 0x67b   : > { %v1371_v37 = vadd.f32 %v1872_v29, %v1288_v34 }
 0x67c   : > { %v1361_v31 = vpop.f32.mrf.mxu1 }
 0x67d   : > { %v1370_v39 = vadd.f32 %v1361_v31, %v1287_v36 }
 0x67e   : > { %v1879_v33 = vpop.f32.mrf.mxu1 }
 0x67f   : > { %v1454_v40 = vadd.f32 %v1879_v33, %v1371_v37 }
 0x680   : > { %v1444_v35 = vpop.f32.mrf.mxu1 }
 0x681   : > { %v1453_v42 = vadd.f32 %v1444_v35, %v1370_v39 }
 0x682   : > { %v1886_v38 = vpop.f32.mrf.mxu1 }
 0x683   : > { %v1537_v43 = vadd.f32 %v1886_v38, %v1454_v40 }
 0x684   : > { %v1527_v41 = vpop.f32.mrf.mxu1 }
 0x685   : > { %v1536_v45 = vadd.f32 %v1527_v41, %v1453_v42 }
 0x686   : > { %v1893_v44 = vpop.f32.mrf.mxu1 }
 0x687   : > { %v1620_v46 = vadd.f32 %v1893_v44, %v1537_v43 }
 0x688   : > { %v1610_v47 = vpop.f32.mrf.mxu1 }
 0x689   : > { %1622 = vst.msk [vmem:[%s460_s26 + $0x8] sm:$0xff] %vm850_vm3, %v1620_v46  ;;  %v1619_v48 = vadd.f32 %v1610_v47, %v1536_v45 }
 0x68b   : > { %1621 = vst.msk [vmem:[%s460_s26] sm:$0xff] %vm850_vm3, %v1619_v48 }
 0x68c   : > { %1956 = shalt.err (!%p1953_p3)
}
 0x68d   : > { %s1957_s18 = scalar_lea.hbm %s2278_s20, 256  ;;  %s1961_s27 = scalar_lea.hbm %s2336_s14, 512 }
 0x68e   : > { %p1958_p4 = scmp.ne.s32.totalorder %s2278_s20, %s1957_s18  ;;  %p1962_p9 = scmp.lt.s32.totalorder %s2278_s20, %s2336_s14 }
 0x68f   : > { %p1963_p10 = scmp.lt.s32.totalorder %s1961_s27, %s1957_s18 }
 0x690   : > { %p1959_p7 = pnand %p1958_p4, %p2121_p5 }
 0x691   : > { %p1964_p11 = por %p1963_p10, %p1962_p9 }
 0x692   : > { %p1960_p8 = pneg %p1959_p7 }
 0x694   : > { %p1965_p12 = pnand %p1964_p11, %p1960_p8 }
 0x696   : > { %1968 = shalt.err (!%p1965_p12)
}
 0x697   : > { %s2006_s0 = smov 128   ;;  %s2007_s1 = smov 8  }
 0x698   : > { %1894 = dma.vmem_to_hbm [thread:$0]  (%p2121_p5), %s2273_s15, 256, %s2278_s20, %s2282_s17, %s2006_s0, %s2006_s0, %s2007_s1  }
 0x699 PF: > { %p1900_p13 = scmp.ge.s32.totalorder %s2003_s16, 2  ;;  %s1652_s21 = sand.u32 1, %s1991_s29  }
 0x69a   : > { %s1653_s18 = scalar_lea.sflag [#allocation3], %s1652_s21 }
 0x69b   : > { %p1897_p0 = pnand %p1900_p13, %p2125_p6 }
 0x69d   : > { %p1898_p1 = pneg %p1897_p0 }
 0x69f   : > { %1986 = dma.done.wait (%p1898_p1), %s1653_s18, 256  }
 0x6a0   : > { %1988 = vsyncadd (%p1898_p1), %s1653_s18, 4294967040  ;;  %s2346_s26 = sld [smem:[#allocation5_spill]]  ;;  %p24_p2 = scmp.ge.s32.totalorder %s2108_s19, 4  }
 0x6a1   : > { %s2347_s15 = sld [smem:[#allocation6_spill]]  ;;  %s2348_s29 = smov %s1995_s30 }
 0x6a2   : > { %s2350_s16 = smov %s2108_s19  ;;  %26 = sbr.rel (!%p24_p2) target bundleno = 6 (0x6), region = 111 }
 0x6a6   : > { %s2349_s30 = smov %s2346_s26 }
 0x6a7   :  { %1658 = vsyncpa [#allocation3], 1 }
 0x6a8   :  { %1660 = vsyncpa [#allocation3 + $0x1], 1 }

</bundles_post_ra>
